<compile_context>
chip_gen: v5e
topology: v5e:2x2
jax: 0.10.0
libtpu: 0.0.40
codegen_flags: <defaults>
</compile_context>

<pallas_src>
import functools
import math

import jax
import jax.numpy as jnp
from jax import lax
from jax.experimental import pallas as pl
from jax.experimental.pallas import tpu as pltpu


NEG_FILL = -1e9     # matches PyTorch masked_fill(mask == 0, -1e9)
SKIP_M = -1e30      # per-stripe max placeholder for skipped (fully masked) tiles


def _round_up(x, m):
    return ((x + m - 1) // m) * m


def _sdpa_kernel(*refs, sm_scale, seq_len, causal, use_mask, pad_cols, n_kv):
    if use_mask:
        (q_ref, k_ref, v_ref, mask_ref,
         out_ref, p_ref, m_scr, l_scr, acc_scr, mstep_scr) = refs
    else:
        (q_ref, k_ref, v_ref,
         out_ref, p_ref, m_scr, l_scr, acc_scr, mstep_scr) = refs
        mask_ref = None

    q_idx = pl.program_id(1)
    kv_idx = pl.program_id(2)
    tq = q_ref.shape[0]
    tkv = k_ref.shape[0]
    # 128-aligned lane offset of this KV stripe inside the (TQ, s_pad) p block.
    col0 = pl.multiple_of(kv_idx * tkv, 128)

    @pl.when(kv_idx == 0)
    def _init():
        m_scr[...] = jnp.full(m_scr.shape, -jnp.inf, m_scr.dtype)
        l_scr[...] = jnp.zeros(l_scr.shape, l_scr.dtype)
        acc_scr[...] = jnp.zeros(acc_scr.shape, acc_scr.dtype)

    def _step():
        q = q_ref[...]                      # (TQ, Dp), input dtype (bf16 -> bf16 MXU path)
        k = k_ref[...]                      # (TK, Dp)

        # QK^T: contract the last dims directly (no materialized k.T, no XLU transpose).
        s = lax.dot_general(q, k, (((1,), (1,)), ((), ())),
                            preferred_element_type=jnp.float32)
        s = s * jnp.float32(sm_scale)

        neg = jnp.float32(NEG_FILL)
        if use_mask:
            s = jnp.where(mask_ref[...] != 0, s, neg)
        elif causal or pad_cols:
            col = kv_idx * tkv + lax.broadcasted_iota(jnp.int32, (tq, tkv), 1)
            if causal:
                row = q_idx * tq + lax.broadcasted_iota(jnp.int32, (tq, tkv), 0)
                keep = row >= col
                if pad_cols:
                    keep = jnp.logical_and(keep, col < seq_len)
            else:
                keep = col < seq_len
            s = jnp.where(keep, s, neg)

        # Online softmax (flash-attention) update -- every score exp'd exactly once.
        m_prev = m_scr[...]                                        # (TQ, 1)
        m_new = jnp.maximum(m_prev, jnp.max(s, axis=-1, keepdims=True))
        alpha = jnp.exp(m_prev - m_new)
        p_tile = jnp.exp(s - m_new)                                # f32, in [0, 1]
        l_scr[...] = alpha * l_scr[...] + jnp.sum(p_tile, axis=-1, keepdims=True)
        acc_scr[...] = alpha * acc_scr[...] + jnp.dot(
            p_tile.astype(v_ref.dtype), v_ref[...],
            preferred_element_type=jnp.float32)
        m_scr[...] = m_new

        # Lane-dense stripe store (128-aligned dynamic lane offset -> unmasked vst)
        # plus this stripe's running max for the finalize rescale.
        p_ref[:, pl.ds(col0, tkv)] = p_tile.astype(p_ref.dtype)
        mstep_scr[kv_idx] = m_new

    if causal and not use_mask:
        # Skip KV tiles lying entirely above the causal diagonal for this query tile.
        first_col = kv_idx * tkv
        last_row = (q_idx + 1) * tq - 1
        pl.when(first_col <= last_row)(_step)

        @pl.when(first_col > last_row)
        def _skip():
            p_ref[:, pl.ds(col0, tkv)] = jnp.zeros((tq, tkv), p_ref.dtype)
            mstep_scr[kv_idx] = jnp.full((tq, 1), SKIP_M, mstep_scr.dtype)
    else:
        _step()

    @pl.when(kv_idx == n_kv - 1)
    def _finalize():
        m_final = m_scr[...]                               # (TQ, 1)
        inv_l = pl.reciprocal(l_scr[...], approx=True)     # EUP, off the VALU path
        out_ref[...] = (acc_scr[...] * inv_l).astype(out_ref.dtype)
        # Rescale each stored stripe: p_j *= exp(m_j - m_final) / l.  Only a (TQ, 1)
        # exp and a broadcast multiply per stripe -- no re-exp of the (TQ, S) slab.
        for j in range(n_kv):                              # n_kv is a Python int
            corr = jnp.exp(mstep_scr[j] - m_final) * inv_l          # (TQ, 1)
            stripe = p_ref[:, j * tkv:(j + 1) * tkv].astype(jnp.float32)
            p_ref[:, j * tkv:(j + 1) * tkv] = (stripe * corr).astype(p_ref.dtype)


def scaled_dot_product_attention(query, key, value, mask=None, dropout=None, *,
                                 causal=False, block_q=128, block_kv=256,
                                 vmem_limit_bytes=None):
    """Flash-style SDPA.  Returns (p_attn @ value, p_attn) like the PyTorch module.

    If `causal=True` and `mask is None`, the lower-triangular mask is generated
    inside the kernel (no HBM mask traffic) and fully-masked KV tiles are skipped.
    An explicit `mask` (nonzero=keep) is shipped as int8 tiles.  Defaults
    (block_q=128, block_kv=256) suit v6e/v7x; use block_kv=128 on v5e.
    """
    if dropout is not None:
        # TODO(synk): dropout on p_attn not implemented (module's dropout=None path only).
        raise NotImplementedError("dropout is not supported by this kernel")

    B, S, D = query.shape
    if key.shape != (B, S, D) or value.shape != (B, S, D):
        raise ValueError("query/key/value must share the same (B, S, D) shape")
    if block_q % 128 or block_kv % 128:
        raise ValueError("block_q / block_kv must be multiples of 128")

    dtype = query.dtype
    sm_scale = 1.0 / math.sqrt(D)          # d_k of the *unpadded* head dim

    tq = min(block_q, _round_up(S, 128))
    tkv = min(block_kv, _round_up(S, 128))
    tile_lcm = tq * tkv // math.gcd(tq, tkv)
    s_pad = _round_up(S, tile_lcm)
    d_pad = _round_up(D, 128)
    n_kv = s_pad // tkv
    pad_cols = s_pad > S

    def _pad3(x):
        ps, pd = s_pad - x.shape[1], d_pad - x.shape[2]
        if ps == 0 and pd == 0:
            return x
        return jnp.pad(x, ((0, 0), (0, ps), (0, pd)))

    q_p, k_p, v_p = _pad3(query), _pad3(key), _pad3(value)

    use_mask = mask is not None
    operands = [q_p, k_p, v_p]
    in_specs = [
        pl.BlockSpec((None, tq, d_pad), lambda b, i, j: (b, i, 0)),
        pl.BlockSpec((None, tkv, d_pad), lambda b, i, j: (b, j, 0)),
        pl.BlockSpec((None, tkv, d_pad), lambda b, i, j: (b, j, 0)),
        # NOTE: on v5e add pipeline_mode=pl.Buffered(3) to k/v if the KV DMA is exposed.
    ]
    if use_mask:
        m_p = jnp.pad(mask.astype(jnp.int8),
                      ((0, 0), (0, s_pad - S), (0, s_pad - S)))
        operands.append(m_p)
        in_specs.append(pl.BlockSpec((None, tq, tkv), lambda b, i, j: (b, i, j)))

    # p_attn is produced directly as a lane-dense (B, s_pad, s_pad) array; each grid
    # step writes one (TQ, TK) stripe at a 128-aligned lane offset.
    out_shape = (
        jax.ShapeDtypeStruct((B, s_pad, d_pad), dtype),
        jax.ShapeDtypeStruct((B, s_pad, s_pad), dtype),
    )
    out_specs = [
        pl.BlockSpec((None, tq, d_pad), lambda b, i, j: (b, i, 0)),
        pl.BlockSpec((None, tq, s_pad), lambda b, i, j: (b, i, 0)),
    ]
    scratch_shapes = [
        pltpu.VMEM((tq, 1), jnp.float32),          # running max  m
        pltpu.VMEM((tq, 1), jnp.float32),          # running sum  l
        pltpu.VMEM((tq, d_pad), jnp.float32),      # un-normalized output accumulator
        pltpu.VMEM((n_kv, tq, 1), jnp.float32),    # per-stripe running max (finalize rescale)
    ]

    dbytes = jnp.dtype(dtype).itemsize
    if vmem_limit_bytes is None:
        blk_bytes = (
            tq * d_pad * dbytes                         # q
            + 2 * tkv * d_pad * dbytes                  # k, v
            + (tq * tkv if use_mask else 0)             # int8 mask tile
            + tq * d_pad * dbytes                       # out
            + tq * s_pad * dbytes                       # resident lane-dense p block
        )
        scratch_bytes = 4 * (2 * tq + tq * d_pad + n_kv * tq * 128)
        est = 2 * blk_bytes + scratch_bytes             # double-buffered
        try:
            info = pltpu.get_tpu_info()
            vmem_cap = int(getattr(info, "vmem_capacity_bytes", 64 << 20))
        except Exception:
            vmem_cap = 64 << 20                         # conservative: v7x per-TC VMEM
        vmem_limit_bytes = max(32 << 20,
                               min(2 * est + (4 << 20), int(0.75 * vmem_cap)))

    cost = pl.CostEstimate(
        flops=4 * B * s_pad * s_pad * d_pad,
        transcendentals=B * s_pad * s_pad,
        bytes_accessed=(4 * B * s_pad * d_pad + B * s_pad * s_pad) * dbytes
                       + (B * s_pad * s_pad if use_mask else 0),
    )

    kernel = functools.partial(
        _sdpa_kernel,
        sm_scale=sm_scale,
        seq_len=S,
        causal=bool(causal),
        use_mask=use_mask,
        pad_cols=pad_cols,
        n_kv=n_kv,
    )

    grid_spec = pltpu.PrefetchScalarGridSpec(
        num_scalar_prefetch=0,
        grid=(B, s_pad // tq, n_kv),
        in_specs=in_specs,
        out_specs=out_specs,
        scratch_shapes=scratch_shapes,
    )

    out_p, p_p = pl.pallas_call(
        kernel,
        out_shape=out_shape,
        grid_spec=grid_spec,
        compiler_params=pltpu.CompilerParams(
            dimension_semantics=("parallel", "parallel", "arbitrary"),
            vmem_limit_bytes=int(vmem_limit_bytes),
        ),
        cost_estimate=cost,
    )(*operands)

    return out_p[:, :S, :D], p_p[:, :S, :S]


def tril_mask(batch, size):
    """Causal mask: 1 = attend, 0 = masked (future)."""
    m = jnp.tril(jnp.ones((size, size), dtype=jnp.int32))
    return jnp.broadcast_to(m[None, :, :], (batch, size, size))


def _reference(query, key, value, mask=None):
    d_k = query.shape[-1]
    q32, k32, v32 = (x.astype(jnp.float32) for x in (query, key, value))
    scores = jnp.einsum("bqd,bkd->bqk", q32, k32) / math.sqrt(d_k)
    if mask is not None:
        scores = jnp.where(mask == 0, NEG_FILL, scores)
    p = jax.nn.softmax(scores, axis=-1)
    return jnp.einsum("bqk,bkd->bqd", p, v32), p


if __name__ == "__main__":
    # --- Test 1: the module's literal example: (1, 5, 2) with a causal mask. ---
    query = jnp.array(
        [[[0.0, 1.414], [1.414, 0.0], [1.0, 1.0], [-1.0, 1.0], [1.0, -1.0]]],
        dtype=jnp.float32)
    key = query
    value = query
    B, S, D = query.shape
    mask = tril_mask(B, S)
    ref_out, ref_p = _reference(query, key, value, mask)

    # (a) causal mask generated inside the kernel (no HBM mask traffic).
    out_c, p_c = scaled_dot_product_attention(query, key, value, causal=True)
    # (b) explicit (int8-compressed) mask path, matching the module signature.
    out_m, p_m = scaled_dot_product_attention(query, key, value, mask=mask)
    jax.block_until_ready((out_c, p_c, out_m, p_m))

    for o, p in ((out_c, p_c), (out_m, p_m)):
        assert jnp.allclose(o, ref_out, atol=5e-3, rtol=5e-3), "small: output mismatch"
        assert jnp.allclose(p, ref_p, atol=5e-3, rtol=5e-3), "small: p_attn mismatch"

    # --- Test 2: multi-KV-step online softmax + causal tile skipping, f32,
    #     grid = (2, 2, 2) with block 128x128. ---
    rng = jax.random.PRNGKey(0)
    kq, kk, kv = jax.random.split(rng, 3)
    B2, S2, D2 = 2, 256, 32
    q2 = jax.random.normal(kq, (B2, S2, D2), jnp.float32)
    k2 = jax.random.normal(kk, (B2, S2, D2), jnp.float32)
    v2 = jax.random.normal(kv, (B2, S2, D2), jnp.float32)
    mask2 = tril_mask(B2, S2)

    out2, p2 = scaled_dot_product_attention(q2, k2, v2, causal=True,
                                            block_q=128, block_kv=128)
    out2 = jax.block_until_ready(out2)
    ref_out2, ref_p2 = _reference(q2, k2, v2, mask2)
    assert jnp.allclose(out2, ref_out2, atol=5e-3, rtol=5e-3), "f32: output mismatch"
    assert jnp.allclose(p2, ref_p2, atol=5e-3, rtol=5e-3), "f32: p_attn mismatch"
    assert jnp.allclose(jnp.sum(p2, axis=-1), 1.0, atol=5e-3), "f32: rows must sum to 1"

    # --- Test 2b: default tiles (128/256), S not a tile multiple (pad columns),
    #     exercising padded-column masking + skipped tiles + multi-step softmax. ---
    S3 = 384
    q4 = jax.random.normal(kq, (B2, S3, D2), jnp.float32)
    k4 = jax.random.normal(kk, (B2, S3, D2), jnp.float32)
    v4 = jax.random.normal(kv, (B2, S3, D2), jnp.float32)
    out4, p4 = scaled_dot_product_attention(q4, k4, v4, causal=True)
    out4 = jax.block_until_ready(out4)
    ref_out4, ref_p4 = _reference(q4, k4, v4, tril_mask(B2, S3))
    assert jnp.allclose(out4, ref_out4, atol=5e-3, rtol=5e-3), "pad: output mismatch"
    assert jnp.allclose(p4, ref_p4, atol=5e-3, rtol=5e-3), "pad: p_attn mismatch"
    assert jnp.allclose(jnp.sum(p4, axis=-1), 1.0, atol=5e-3), "pad: rows must sum to 1"

    # --- Test 3: bf16 operands feed the MXU (f32 accumulation inside). ---
    q3, k3, v3 = (x.astype(jnp.bfloat16) for x in (q2, k2, v2))
    out3, p3 = scaled_dot_product_attention(q3, k3, v3, causal=True,
                                            block_q=128, block_kv=128)
    out3 = jax.block_until_ready(out3)
    ref_out3, ref_p3 = _reference(q3, k3, v3, mask2)
    assert jnp.allclose(out3.astype(jnp.float32), ref_out3, atol=5e-2, rtol=5e-2), \
        "bf16: output mismatch"
    assert jnp.allclose(p3.astype(jnp.float32), ref_p3, atol=5e-2), "bf16: p_attn mismatch"

    print("KERNEL_OK")
</pallas_src>

<mosaic_0001>
module attributes {stable_mosaic.version = 11 : i64} {
  func.func @_sdpa_kernel(%arg0: i32, %arg1: i32, %arg2: i32, %arg3: memref<1x128x128xf32, #tpu.memory_space<vmem>>, %arg4: memref<1x128x128xf32, #tpu.memory_space<vmem>>, %arg5: memref<1x128x128xf32, #tpu.memory_space<vmem>>, %arg6: memref<1x128x128xf32, #tpu.memory_space<vmem>>, %arg7: memref<1x128x128xf32, #tpu.memory_space<vmem>>, %arg8: memref<128x1xf32, #tpu.memory_space<vmem>>, %arg9: memref<128x1xf32, #tpu.memory_space<vmem>>, %arg10: memref<128x128xf32, #tpu.memory_space<vmem>>, %arg11: memref<1x128x1xf32, #tpu.memory_space<vmem>>) attributes {dimension_semantics = [#tpu.dimension_semantics<parallel>, #tpu.dimension_semantics<parallel>, #tpu.dimension_semantics<arbitrary>], iteration_bounds = array<i64: 1, 1, 1>, scalar_prefetch = 0 : i64, scratch_operands = 4 : i64, tpu.core_type = #tpu.core_type<tc>, window_params = [{transform_indices = @transform_0, window_bounds = array<i64: 1, 128, 128>}, {transform_indices = @transform_1, window_bounds = array<i64: 1, 128, 128>}, {transform_indices = @transform_2, window_bounds = array<i64: 1, 128, 128>}, {transform_indices = @transform_3, window_bounds = array<i64: 1, 128, 128>}, {transform_indices = @transform_4, window_bounds = array<i64: 1, 128, 128>}]} {
    %c128_i32 = arith.constant 128 : i32
    %0 = arith.muli %arg2, %c128_i32 : i32
    %1 = tpu.assume_multiple %0, 128 : i32
    %c0_i32 = arith.constant 0 : i32
    %2 = arith.cmpi eq, %arg2, %c0_i32 : i32
    %3 = arith.extui %2 : i1 to i32
    %c0_i32_0 = arith.constant 0 : i32
    %4 = arith.cmpi ne, %3, %c0_i32_0 : i32
    scf.if %4 {
      %cst = arith.constant 0xFF800000 : f32
      %18 = vector.broadcast %cst : f32 to vector<128x1xf32>
      %c0 = arith.constant 0 : index
      %c0_8 = arith.constant 0 : index
      %19 = vector.load %arg8[%c0, %c0_8] : memref<128x1xf32, #tpu.memory_space<vmem>>, vector<128x1xf32>
      tpu.vector_store %arg8[%c0, %c0_8], %18 {strides = array<i32>} : memref<128x1xf32, #tpu.memory_space<vmem>>, vector<128x1xf32>,
      %cst_9 = arith.constant 0.000000e+00 : f32
      %20 = vector.broadcast %cst_9 : f32 to vector<128x1xf32>
      %c0_10 = arith.constant 0 : index
      %c0_11 = arith.constant 0 : index
      %21 = vector.load %arg9[%c0_10, %c0_11] : memref<128x1xf32, #tpu.memory_space<vmem>>, vector<128x1xf32>
      tpu.vector_store %arg9[%c0_10, %c0_11], %20 {strides = array<i32>} : memref<128x1xf32, #tpu.memory_space<vmem>>, vector<128x1xf32>,
      %cst_12 = arith.constant 0.000000e+00 : f32
      %22 = vector.broadcast %cst_12 : f32 to vector<128x128xf32>
      %c0_13 = arith.constant 0 : index
      %c0_14 = arith.constant 0 : index
      %23 = vector.load %arg10[%c0_13, %c0_14] : memref<128x128xf32, #tpu.memory_space<vmem>>, vector<128x128xf32>
      tpu.vector_store %arg10[%c0_13, %c0_14], %22 {strides = array<i32>} : memref<128x128xf32, #tpu.memory_space<vmem>>, vector<128x128xf32>,
    } else {
    }
    %c128_i32_1 = arith.constant 128 : i32
    %5 = arith.muli %arg2, %c128_i32_1 : i32
    %c1_i32 = arith.constant 1 : i32
    %6 = arith.addi %arg1, %c1_i32 : i32
    %c128_i32_2 = arith.constant 128 : i32
    %7 = arith.muli %6, %c128_i32_2 : i32
    %c1_i32_3 = arith.constant 1 : i32
    %8 = arith.subi %7, %c1_i32_3 : i32
    %9 = arith.cmpi sle, %5, %8 : i32
    %10 = arith.extui %9 : i1 to i32
    %c0_i32_4 = arith.constant 0 : i32
    %11 = arith.cmpi ne, %10, %c0_i32_4 : i32
    scf.if %11 {
      %c0 = arith.constant 0 : index
      %c0_8 = arith.constant 0 : index
      %c0_9 = arith.constant 0 : index
      %18 = vector.load %arg3[%c0, %c0_8, %c0_9] : memref<1x128x128xf32, #tpu.memory_space<vmem>>, vector<1x128x128xf32>
      %19 = vector.shape_cast %18 : vector<1x128x128xf32> to vector<128x128xf32>
      %c0_10 = arith.constant 0 : index
      %c0_11 = arith.constant 0 : index
      %c0_12 = arith.constant 0 : index
      %20 = vector.load %arg4[%c0_10, %c0_11, %c0_12] : memref<1x128x128xf32, #tpu.memory_space<vmem>>, vector<1x128x128xf32>
      %21 = vector.shape_cast %20 : vector<1x128x128xf32> to vector<128x128xf32>
      %cst = arith.constant dense<0.000000e+00> : vector<128x128xf32>
      %22 = tpu.matmul %19, %21, %cst {dimension_numbers = #tpu.dot_dimension_numbers<[1], [1], [0], [0], [0, 0, 1, 0], [], []>} : vector<128x128xf32>, vector<128x128xf32>, vector<128x128xf32> -> vector<128x128xf32>
      %cst_13 = arith.constant 0.707106769 : f32
      %23 = vector.broadcast %cst_13 : f32 to vector<128x128xf32>
      %24 = arith.mulf %22, %23 : vector<128x128xf32>
      %c128_i32_14 = arith.constant 128 : i32
      %25 = arith.muli %arg2, %c128_i32_14 : i32
      %26 = tpu.iota {dimensions = array<i32: 1>} : vector<128x128xi32>
      %27 = vector.broadcast %25 : i32 to vector<128x128xi32>
      %28 = arith.addi %27, %26 : vector<128x128xi32>
      %c128_i32_15 = arith.constant 128 : i32
      %29 = arith.muli %arg1, %c128_i32_15 : i32
      %30 = tpu.iota {dimensions = array<i32: 0>} : vector<128x128xi32>
      %31 = vector.broadcast %29 : i32 to vector<128x128xi32>
      %32 = arith.addi %31, %30 : vector<128x128xi32>
      %33 = arith.cmpi sge, %32, %28 : vector<128x128xi32>
      %c5_i32 = arith.constant 5 : i32
      %34 = vector.broadcast %c5_i32 : i32 to vector<128x128xi32>
      %35 = arith.cmpi slt, %28, %34 : vector<128x128xi32>
      %36 = arith.andi %33, %35 : vector<128x128xi1>
      %cst_16 = arith.constant -1.000000e+09 : f32
      %37 = vector.broadcast %cst_16 : f32 to vector<128x128xf32>
      %38 = arith.select %36, %24, %37 : vector<128x128xi1>, vector<128x128xf32>
      %c0_17 = arith.constant 0 : index
      %c0_18 = arith.constant 0 : index
      %39 = vector.load %arg8[%c0_17, %c0_18] : memref<128x1xf32, #tpu.memory_space<vmem>>, vector<128x1xf32>
      %cst_19 = arith.constant dense<0xFF800000> : vector<128xf32>
      %40 = vector.multi_reduction <maximumf>, %38, %cst_19 [1] : vector<128x128xf32> to vector<128xf32>
      %41 = vector.shape_cast %40 : vector<128xf32> to vector<128x1xf32>
      %42 = arith.maximumf %39, %41 : vector<128x1xf32>
      %43 = arith.subf %39, %42 : vector<128x1xf32>
      %44 = math.exp %43 : vector<128x1xf32>
      %45 = vector.broadcast %42 : vector<128x1xf32> to vector<128x128xf32>
      %46 = arith.subf %38, %45 : vector<128x128xf32>
      %47 = math.exp %46 : vector<128x128xf32>
      %c0_20 = arith.constant 0 : index
      %c0_21 = arith.constant 0 : index
      %48 = vector.load %arg9[%c0_20, %c0_21] : memref<128x1xf32, #tpu.memory_space<vmem>>, vector<128x1xf32>
      %49 = arith.mulf %44, %48 : vector<128x1xf32>
      %cst_22 = arith.constant dense<0.000000e+00> : vector<128xf32>
      %50 = vector.multi_reduction <add>, %47, %cst_22 [1] : vector<128x128xf32> to vector<128xf32>
      %51 = vector.shape_cast %50 : vector<128xf32> to vector<128x1xf32>
      %52 = arith.addf %49, %51 : vector<128x1xf32>
      %c0_23 = arith.constant 0 : index
      %c0_24 = arith.constant 0 : index
      %53 = vector.load %arg9[%c0_23, %c0_24] : memref<128x1xf32, #tpu.memory_space<vmem>>, vector<128x1xf32>
      tpu.vector_store %arg9[%c0_23, %c0_24], %52 {strides = array<i32>} : memref<128x1xf32, #tpu.memory_space<vmem>>, vector<128x1xf32>,
      %c0_25 = arith.constant 0 : index
      %c0_26 = arith.constant 0 : index
      %54 = vector.load %arg10[%c0_25, %c0_26] : memref<128x128xf32, #tpu.memory_space<vmem>>, vector<128x128xf32>
      %55 = vector.broadcast %44 : vector<128x1xf32> to vector<128x128xf32>
      %56 = arith.mulf %55, %54 : vector<128x128xf32>
      %c0_27 = arith.constant 0 : index
      %c0_28 = arith.constant 0 : index
      %c0_29 = arith.constant 0 : index
      %57 = vector.load %arg5[%c0_27, %c0_28, %c0_29] : memref<1x128x128xf32, #tpu.memory_space<vmem>>, vector<1x128x128xf32>
      %58 = vector.shape_cast %57 : vector<1x128x128xf32> to vector<128x128xf32>
      %cst_30 = arith.constant dense<0.000000e+00> : vector<128x128xf32>
      %59 = tpu.matmul %47, %58, %cst_30 {dimension_numbers = #tpu.dot_dimension_numbers<[1], [0], [0], [1], [0, 0, 1, 1], [], []>} : vector<128x128xf32>, vector<128x128xf32>, vector<128x128xf32> -> vector<128x128xf32>
      %60 = arith.addf %56, %59 : vector<128x128xf32>
      %c0_31 = arith.constant 0 : index
      %c0_32 = arith.constant 0 : index
      %61 = vector.load %arg10[%c0_31, %c0_32] : memref<128x128xf32, #tpu.memory_space<vmem>>, vector<128x128xf32>
      tpu.vector_store %arg10[%c0_31, %c0_32], %60 {strides = array<i32>} : memref<128x128xf32, #tpu.memory_space<vmem>>, vector<128x128xf32>,
      %c0_33 = arith.constant 0 : index
      %c0_34 = arith.constant 0 : index
      %62 = vector.load %arg8[%c0_33, %c0_34] : memref<128x1xf32, #tpu.memory_space<vmem>>, vector<128x1xf32>
      tpu.vector_store %arg8[%c0_33, %c0_34], %42 {strides = array<i32>} : memref<128x1xf32, #tpu.memory_space<vmem>>, vector<128x1xf32>,
      %c0_35 = arith.constant 0 : index
      %c0_36 = arith.constant 0 : index
      %63 = arith.index_cast %1 : i32 to index
      %64 = vector.load %arg7[%c0_35, %c0_36, %63] : memref<1x128x128xf32, #tpu.memory_space<vmem>>, vector<1x128x128xf32>
      %65 = vector.shape_cast %64 : vector<1x128x128xf32> to vector<128x128xf32>
      %66 = vector.shape_cast %47 : vector<128x128xf32> to vector<1x128x128xf32>
      tpu.vector_store %arg7[%c0_35, %c0_36, %63], %66 {strides = array<i32>} : memref<1x128x128xf32, #tpu.memory_space<vmem>>, vector<1x128x128xf32>,
      %67 = arith.index_cast %arg2 : i32 to index
      %c0_37 = arith.constant 0 : index
      %c0_38 = arith.constant 0 : index
      %68 = vector.load %arg11[%67, %c0_37, %c0_38] : memref<1x128x1xf32, #tpu.memory_space<vmem>>, vector<1x128x1xf32>
      %69 = vector.shape_cast %68 : vector<1x128x1xf32> to vector<128x1xf32>
      %70 = vector.shape_cast %42 : vector<128x1xf32> to vector<1x128x1xf32>
      tpu.vector_store %arg11[%67, %c0_37, %c0_38], %70 {strides = array<i32>} : memref<1x128x1xf32, #tpu.memory_space<vmem>>, vector<1x128x1xf32>,
    } else {
    }
    %12 = arith.cmpi sgt, %5, %8 : i32
    %13 = arith.extui %12 : i1 to i32
    %c0_i32_5 = arith.constant 0 : i32
    %14 = arith.cmpi ne, %13, %c0_i32_5 : i32
    scf.if %14 {
      %cst = arith.constant 0.000000e+00 : f32
      %18 = vector.broadcast %cst : f32 to vector<128x128xf32>
      %c0 = arith.constant 0 : index
      %c0_8 = arith.constant 0 : index
      %19 = arith.index_cast %1 : i32 to index
      %20 = vector.load %arg7[%c0, %c0_8, %19] : memref<1x128x128xf32, #tpu.memory_space<vmem>>, vector<1x128x128xf32>
      %21 = vector.shape_cast %20 : vector<1x128x128xf32> to vector<128x128xf32>
      %22 = vector.shape_cast %18 : vector<128x128xf32> to vector<1x128x128xf32>
      tpu.vector_store %arg7[%c0, %c0_8, %19], %22 {strides = array<i32>} : memref<1x128x128xf32, #tpu.memory_space<vmem>>, vector<1x128x128xf32>,
      %cst_9 = arith.constant -1.000000e+30 : f32
      %23 = vector.broadcast %cst_9 : f32 to vector<128x1xf32>
      %24 = arith.index_cast %arg2 : i32 to index
      %c0_10 = arith.constant 0 : index
      %c0_11 = arith.constant 0 : index
      %25 = vector.load %arg11[%24, %c0_10, %c0_11] : memref<1x128x1xf32, #tpu.memory_space<vmem>>, vector<1x128x1xf32>
      %26 = vector.shape_cast %25 : vector<1x128x1xf32> to vector<128x1xf32>
      %27 = vector.shape_cast %23 : vector<128x1xf32> to vector<1x128x1xf32>
      tpu.vector_store %arg11[%24, %c0_10, %c0_11], %27 {strides = array<i32>} : memref<1x128x1xf32, #tpu.memory_space<vmem>>, vector<1x128x1xf32>,
    } else {
    }
    %c0_i32_6 = arith.constant 0 : i32
    %15 = arith.cmpi eq, %arg2, %c0_i32_6 : i32
    %16 = arith.extui %15 : i1 to i32
    %c0_i32_7 = arith.constant 0 : i32
    %17 = arith.cmpi ne, %16, %c0_i32_7 : i32
    scf.if %17 {
      %c0 = arith.constant 0 : index
      %c0_8 = arith.constant 0 : index
      %18 = vector.load %arg8[%c0, %c0_8] : memref<128x1xf32, #tpu.memory_space<vmem>>, vector<128x1xf32>
      %c0_9 = arith.constant 0 : index
      %c0_10 = arith.constant 0 : index
      %19 = vector.load %arg9[%c0_9, %c0_10] : memref<128x1xf32, #tpu.memory_space<vmem>>, vector<128x1xf32>
      %20 = tpu.reciprocal %19 {approx = true} : vector<128x1xf32> -> vector<128x1xf32>
      %c0_11 = arith.constant 0 : index
      %c0_12 = arith.constant 0 : index
      %21 = vector.load %arg10[%c0_11, %c0_12] : memref<128x128xf32, #tpu.memory_space<vmem>>, vector<128x128xf32>
      %22 = vector.broadcast %20 : vector<128x1xf32> to vector<128x128xf32>
      %23 = arith.mulf %21, %22 : vector<128x128xf32>
      %c0_13 = arith.constant 0 : index
      %c0_14 = arith.constant 0 : index
      %c0_15 = arith.constant 0 : index
      %24 = vector.load %arg6[%c0_13, %c0_14, %c0_15] : memref<1x128x128xf32, #tpu.memory_space<vmem>>, vector<1x128x128xf32>
      %25 = vector.shape_cast %24 : vector<1x128x128xf32> to vector<128x128xf32>
      %26 = vector.shape_cast %23 : vector<128x128xf32> to vector<1x128x128xf32>
      tpu.vector_store %arg6[%c0_13, %c0_14, %c0_15], %26 {strides = array<i32>} : memref<1x128x128xf32, #tpu.memory_space<vmem>>, vector<1x128x128xf32>,
      %c0_16 = arith.constant 0 : index
      %c0_17 = arith.constant 0 : index
      %c0_18 = arith.constant 0 : index
      %27 = vector.load %arg11[%c0_16, %c0_17, %c0_18] : memref<1x128x1xf32, #tpu.memory_space<vmem>>, vector<1x128x1xf32>
      %28 = vector.shape_cast %27 : vector<1x128x1xf32> to vector<128x1xf32>
      %29 = arith.subf %28, %18 : vector<128x1xf32>
      %30 = math.exp %29 : vector<128x1xf32>
      %31 = arith.mulf %30, %20 : vector<128x1xf32>
      %c0_19 = arith.constant 0 : index
      %c0_20 = arith.constant 0 : index
      %c0_21 = arith.constant 0 : index
      %32 = vector.load %arg7[%c0_19, %c0_20, %c0_21] : memref<1x128x128xf32, #tpu.memory_space<vmem>>, vector<1x128x128xf32>
      %33 = vector.shape_cast %32 : vector<1x128x128xf32> to vector<128x128xf32>
      %34 = vector.broadcast %31 : vector<128x1xf32> to vector<128x128xf32>
      %35 = arith.mulf %33, %34 : vector<128x128xf32>
      %c0_22 = arith.constant 0 : index
      %c0_23 = arith.constant 0 : index
      %c0_24 = arith.constant 0 : index
      %36 = vector.load %arg7[%c0_22, %c0_23, %c0_24] : memref<1x128x128xf32, #tpu.memory_space<vmem>>, vector<1x128x128xf32>
      %37 = vector.shape_cast %36 : vector<1x128x128xf32> to vector<128x128xf32>
      %38 = vector.shape_cast %35 : vector<128x128xf32> to vector<1x128x128xf32>
      tpu.vector_store %arg7[%c0_22, %c0_23, %c0_24], %38 {strides = array<i32>} : memref<1x128x128xf32, #tpu.memory_space<vmem>>, vector<1x128x128xf32>,
    } else {
    }
    return
  }
  func.func @transform_0(%arg0: i32, %arg1: i32, %arg2: i32) -> (i32, i32, i32) {
    %c0_i32 = arith.constant 0 : i32
    %c0_i32_0 = arith.constant 0 : i32
    return %arg0, %arg1, %c0_i32 : i32, i32, i32
  }
  func.func @transform_1(%arg0: i32, %arg1: i32, %arg2: i32) -> (i32, i32, i32) {
    %c0_i32 = arith.constant 0 : i32
    %c0_i32_0 = arith.constant 0 : i32
    return %arg0, %arg2, %c0_i32 : i32, i32, i32
  }
  func.func @transform_2(%arg0: i32, %arg1: i32, %arg2: i32) -> (i32, i32, i32) {
    %c0_i32 = arith.constant 0 : i32
    %c0_i32_0 = arith.constant 0 : i32
    return %arg0, %arg2, %c0_i32 : i32, i32, i32
  }
  func.func @transform_3(%arg0: i32, %arg1: i32, %arg2: i32) -> (i32, i32, i32) {
    %c0_i32 = arith.constant 0 : i32
    %c0_i32_0 = arith.constant 0 : i32
    return %arg0, %arg1, %c0_i32 : i32, i32, i32
  }
  func.func @transform_4(%arg0: i32, %arg1: i32, %arg2: i32) -> (i32, i32, i32) {
    %c0_i32 = arith.constant 0 : i32
    %c0_i32_0 = arith.constant 0 : i32
    return %arg0, %arg1, %c0_i32 : i32, i32, i32
  }
}

</mosaic_0001>

<bundles_post_ra>
// kernel: tpu_custom_call.1
= control target key start
LH: loop header
LB: loop body
LE: loop exit
PB: predicated region body
PF: predicated region fallthrough
CT: control target
= control target key end

     0   :  { %10 = vsyncpa [#allocation7], 0  ;;  %s2297_s0 = inlined_call_operand.hbm [shape: f32[1,128,128], index: 0, kind: input, shape index: {}]   ;;  %s2298_s1 = inlined_call_operand.hbm [shape: f32[1,128,128], index: 1, kind: input, shape index: {}]   ;;  %s2299_s2 = inlined_call_operand.hbm [shape: f32[1,128,128], index: 2, kind: input, shape index: {}]   ;;  %s2300_s3 = inlined_call_operand.hbm [shape: f32[1,128,128], index: 3, kind: output, shape index: {0}]   ;;  %s2301_s4 = inlined_call_operand.hbm [shape: f32[1,128,128], index: 4, kind: output, shape index: {1}]  }
   0x1   :  { %11 = vsyncpa [#allocation10], 0 }
   0x2   :  { %12 = vsyncpa [#allocation8], 0 }
   0x3   :  { %13 = vsyncpa [#allocation14], 0  ;;  %s31_s17 = sshll.u32 %s2298_s1, 4  ;;  %s1742_s18 = smov [#allocation9]   ;;  %s32_s17 = int_to_ptr.hbm [resolvable:$true] %s31_s17 }
   0x4   :  { %s33_s19 = sshll.u32 %s1742_s18, 4  ;;  %s18_s22 = sshll.u32 %s2297_s0, 4  ;;  %s34_s19 = int_to_ptr.vmem [resolvable:$true] %s33_s19  ;;  %s19_s22 = int_to_ptr.hbm [resolvable:$true] %s18_s22 }
   0x5   :  { %s1743_s23 = smov 128   ;;  %s1744_s24 = smov 8  }
   0x6   :  { %39 = dma.hbm_to_vmem [thread:$0]  %s32_s17, 2048, %s34_s19, [#allocation10], %s1743_s23, %s1743_s23, %s1744_s24  }
   0x7   :  { %s1745_s25 = smov [#allocation6]   ;;  %s44_s1 = sshll.u32 %s2299_s2, 4  ;;  %s45_s1 = int_to_ptr.hbm [resolvable:$true] %s44_s1 }
   0x8   :  { %s20_s26 = sshll.u32 %s1745_s25, 4  ;;  %s1746_s0 = smov [#allocation11]   ;;  %s21_s26 = int_to_ptr.vmem [resolvable:$true] %s20_s26 }
   0x9   :  { %26 = dma.hbm_to_vmem [thread:$0]  %s19_s22, 2048, %s21_s26, [#allocation7], %s1743_s23, %s1743_s23, %s1744_s24  }
   0xa   :  { %s46_s29 = sshll.u32 %s1746_s0, 4  ;;  %s47_s29 = int_to_ptr.vmem [resolvable:$true] %s46_s29 }
   0xb   :  { %52 = dma.hbm_to_vmem [thread:$0]  %s45_s1, 2048, %s47_s29, [#allocation10], %s1743_s23, %s1743_s23, %s1744_s24  }
   0xc   :  { %1734 = dma.done.wait [#allocation7], 2048  }
   0xd   :  { %1735 = vsyncadd [#allocation7], 4294965248 }
   0xe   :  { %1736 = dma.done.wait [#allocation10], 4096  }
   0xf   :  { %1737 = vsyncadd [#allocation10], 4294963200  ;;  %v157_v0 = vld [vmem:[#allocation9 + $0x78] sm:$0xff]  ;;  %v156_v1 = vld [vmem:[#allocation9 + $0x70] sm:$0xff]  ;;  %v239_v32 = vlaneseq  ;;  %s1750_s2 = smov [#allocation12]   ;;  %s1375_s7 = sshll.u32 %s2300_s3, 4  ;;  %s1376_s7 = int_to_ptr.hbm [resolvable:$true] %s1375_s7 }
  0x10   :  { %158 = vmatpush.xpose.msra.mxu0 %v157_v0  ;;  %1409 = vmatpush.xpose.msra.mxu2 %v157_v0  ;;  %v155_v2 = vld [vmem:[#allocation9 + $0x68] sm:$0xff]  ;;  %v154_v3 = vld [vmem:[#allocation9 + $0x60] sm:$0xff]  ;;  %v153_v4 = vld [vmem:[#allocation9 + $0x58] sm:$0xff]  ;;  %s1373_s30 = sshll.u32 %s1750_s2, 4  ;;  %s1751_s8 = smov [#allocation13]   ;;  %s1374_s30 = int_to_ptr.vmem [resolvable:$true] %s1373_s30 }
  0x11   :  { %1410 = vmatpush.xpose.msra.mxu3 %v157_v0  ;;  %v152_v5 = vld [vmem:[#allocation9 + $0x50] sm:$0xff]  ;;  %v151_v6 = vld [vmem:[#allocation9 + $0x48] sm:$0xff]  ;;  %v150_v7 = vld [vmem:[#allocation9 + $0x40] sm:$0xff]  ;;  %v1795_v33 = vand.u32 127, %v239_v32  ;;  %v1797_v34 = vshrl.u32 %v239_v32, 7  ;;  %s1386_s9 = sshll.u32 %s1751_s8, 4  ;;  %s1387_s9 = int_to_ptr.vmem [resolvable:$true] %s1386_s9 }
  0x12   :  { %v149_v8 = vld [vmem:[#allocation9 + $0x38] sm:$0xff]  ;;  %v148_v9 = vld [vmem:[#allocation9 + $0x30] sm:$0xff]  ;;  %v147_v10 = vld [vmem:[#allocation9 + $0x28] sm:$0xff]  ;;  %s1388_s11 = sshll.u32 %s2301_s4, 4  ;;  %s1389_s11 = int_to_ptr.hbm [resolvable:$true] %s1388_s11 }
  0x13   :  { %v146_v11 = vld [vmem:[#allocation9 + $0x20] sm:$0xff]  ;;  %v145_v12 = vld [vmem:[#allocation9 + $0x18] sm:$0xff]  ;;  %v144_v13 = vld [vmem:[#allocation9 + $0x10] sm:$0xff]  ;;  %vm278_vm0 = vcmp.ge.s32.totalorder %v1797_v34, %v1795_v33  ;;  %vm294_vm1 = vcmp.lt.s32.totalorder %v1795_v33, 5  ;;  %v250_v35 = vadd.s32 40, %v1797_v34  ;;  %v257_v37 = vadd.s32 96, %v1797_v34 }
  0x14   :  { %159 = vmatpush.xpose.msra.mxu0 %v156_v1  ;;  %1411 = vmatpush.xpose.msra.mxu2 %v156_v1  ;;  %v143_v14 = vld [vmem:[#allocation9 + $0x8] sm:$0xff]  ;;  %v142_v15 = vld [vmem:[#allocation9] sm:$0xff]  ;;  %v132_v20 = vld [vmem:[#allocation6 + $0x30] sm:$0xff]  ;;  %v246_v43 = vadd.s32 8, %v1797_v34  ;;  %v258_v46 = vadd.s32 104, %v1797_v34  ;;  %v247_v51 = vadd.s32 16, %v1797_v34 }
  0x15   :  { %1412 = vmatpush.xpose.msra.mxu3 %v156_v1  ;;  %v126_v16 = vld [vmem:[#allocation6] sm:$0xff]  ;;  %v131_v17 = vld [vmem:[#allocation6 + $0x28] sm:$0xff]  ;;  %v128_v22 = vld [vmem:[#allocation6 + $0x10] sm:$0xff]  ;;  %vm283_vm3 = vcmp.ge.s32.totalorder %v250_v35, %v1795_v33  ;;  %vm290_vm4 = vcmp.ge.s32.totalorder %v257_v37, %v1795_v33  ;;  %v251_v53 = vadd.s32 48, %v1797_v34  ;;  %v259_v56 = vadd.s32 112, %v1797_v34 }
  0x16   :  { %v138_v18 = vld [vmem:[#allocation6 + $0x60] sm:$0xff]  ;;  %v127_v19 = vld [vmem:[#allocation6 + $0x8] sm:$0xff]  ;;  %v133_v23 = vld [vmem:[#allocation6 + $0x38] sm:$0xff]  ;;  %vm279_vm7 = vcmp.ge.s32.totalorder %v246_v43, %v1795_v33  ;;  %vm291_vm8 = vcmp.ge.s32.totalorder %v258_v46, %v1795_v33  ;;  %vm280_vm11 = vcmp.ge.s32.totalorder %v247_v51, %v1795_v33  ;;  %v252_v62 = vadd.s32 56, %v1797_v34 }
  0x17   :  { %v139_v21 = vld [vmem:[#allocation6 + $0x68] sm:$0xff]  ;;  %v140_v24 = vld [vmem:[#allocation6 + $0x70] sm:$0xff]  ;;  %v134_v25 = vld [vmem:[#allocation6 + $0x40] sm:$0xff]  ;;  %vm284_vm12 = vcmp.ge.s32.totalorder %v251_v53, %v1795_v33  ;;  %vm292_vm13 = vcmp.ge.s32.totalorder %v259_v56, %v1795_v33  ;;  %v253_v0 = vadd.s32 64, %v1797_v34  ;;  %v1748_v37 = vmov 0  }
  0x18   :  { %160 = vmatpush.xpose.msra.mxu0 %v155_v2  ;;  %1413 = vmatpush.xpose.msra.mxu2 %v155_v2  ;;  %v129_v26 = vld [vmem:[#allocation6 + $0x18] sm:$0xff]  ;;  %v135_v28 = vld [vmem:[#allocation6 + $0x48] sm:$0xff]  ;;  %v130_v29 = vld [vmem:[#allocation6 + $0x20] sm:$0xff] }
  0x19   :  { %1414 = vmatpush.xpose.msra.mxu3 %v155_v2  ;;  %v141_v27 = vld [vmem:[#allocation6 + $0x78] sm:$0xff]  ;;  %v136_v30 = vld [vmem:[#allocation6 + $0x50] sm:$0xff]  ;;  %vm295_vm2 = vmand %vm278_vm0, %vm294_vm1  ;;  %1483 = vset.pattern.permute.xlu1 %v1748_v37 }
  0x1a   :  { %v137_v31 = vld [vmem:[#allocation6 + $0x58] sm:$0xff]  ;;  %vm300_vm5 = vmand %vm283_vm3, %vm294_vm1  ;;  %vm70_vm3 = vcmask 7168   ;;  %1484 = vset.pattern.permute.xlu2 %v1748_v37  ;;  %1485 = vset.pattern.permute.xlu0 %v1748_v37 }
  0x1b   :  { %vm307_vm6 = vmand %vm290_vm4, %vm294_vm1  ;;  %vm286_vm4 = vcmp.ge.s32.totalorder %v253_v0, %v1795_v33 }
  0x1c   :  { %161 = vmatpush.xpose.msra.mxu0 %v154_v3  ;;  %1415 = vmatpush.xpose.msra.mxu2 %v154_v3  ;;  %vm296_vm9 = vmand %vm279_vm7, %vm294_vm1 }
  0x1d   :  { %1416 = vmatpush.xpose.msra.mxu3 %v154_v3  ;;  %vm308_vm10 = vmand %vm291_vm8, %vm294_vm1  ;;  %v260_v3 = vadd.s32 120, %v1797_v34 }
  0x1e   :  { %vm297_vm14 = vmand %vm280_vm11, %vm294_vm1 }
  0x1f   :  { %vm301_vm15 = vmand %vm284_vm12, %vm294_vm1 }
  0x20   :  { %162 = vmatpush.xpose.msra.mxu0 %v153_v4  ;;  %1417 = vmatpush.xpose.msra.mxu2 %v153_v4  ;;  %vm309_vm0 = vmand %vm292_vm13, %vm294_vm1 }
  0x21   :  { %1418 = vmatpush.xpose.msra.mxu3 %v153_v4  ;;  %vm303_vm7 = vmand %vm286_vm4, %vm294_vm1 }
  0x24   :  { %163 = vmatpush.xpose.msra.mxu0 %v152_v5  ;;  %1419 = vmatpush.xpose.msra.mxu2 %v152_v5 }
  0x25   :  { %1420 = vmatpush.xpose.msra.mxu3 %v152_v5 }
  0x28   :  { %164 = vmatpush.xpose.msra.mxu0 %v151_v6  ;;  %1421 = vmatpush.xpose.msra.mxu2 %v151_v6 }
  0x29   :  { %1422 = vmatpush.xpose.msra.mxu3 %v151_v6 }
  0x2c   :  { %165 = vmatpush.xpose.msra.mxu0 %v150_v7  ;;  %1423 = vmatpush.xpose.msra.mxu2 %v150_v7 }
  0x2d   :  { %1424 = vmatpush.xpose.msra.mxu3 %v150_v7  ;;  %v1747_v7 = vmov -inf  }
  0x2e   :  { %71 = vst.msk [vmem:[#allocation2] sm:$0xff] %vm70_vm3, %v1747_v7 }
  0x2f   :  { %72 = vst.msk [vmem:[#allocation2 + $0x8] sm:$0xff] %vm70_vm3, %v1747_v7 }
  0x30   :  { %166 = vmatpush.xpose.msra.mxu0 %v149_v8  ;;  %1425 = vmatpush.xpose.msra.mxu2 %v149_v8  ;;  %73 = vst.msk [vmem:[#allocation2 + $0x10] sm:$0xff] %vm70_vm3, %v1747_v7 }
  0x31   :  { %1426 = vmatpush.xpose.msra.mxu3 %v149_v8  ;;  %74 = vst.msk [vmem:[#allocation2 + $0x18] sm:$0xff] %vm70_vm3, %v1747_v7 }
  0x32   :  { %75 = vst.msk [vmem:[#allocation2 + $0x20] sm:$0xff] %vm70_vm3, %v1747_v7 }
  0x33   :  { %76 = vst.msk [vmem:[#allocation2 + $0x28] sm:$0xff] %vm70_vm3, %v1747_v7 }
  0x34   :  { %167 = vmatpush.xpose.msra.mxu0 %v148_v9  ;;  %1427 = vmatpush.xpose.msra.mxu2 %v148_v9  ;;  %77 = vst.msk [vmem:[#allocation2 + $0x30] sm:$0xff] %vm70_vm3, %v1747_v7 }
  0x35   :  { %1428 = vmatpush.xpose.msra.mxu3 %v148_v9  ;;  %v248_v9 = vadd.s32 24, %v1797_v34  ;;  %78 = vst.msk [vmem:[#allocation2 + $0x38] sm:$0xff] %vm70_vm3, %v1747_v7 }
  0x36   :  { %79 = vst.msk [vmem:[#allocation2 + $0x40] sm:$0xff] %vm70_vm3, %v1747_v7  ;;  %v328_v53 = vld [vmem:[#allocation2 + $0x8] sm:$0xff] }
  0x37   :  { %80 = vst.msk [vmem:[#allocation2 + $0x48] sm:$0xff] %vm70_vm3, %v1747_v7  ;;  %v329_v0 = vld [vmem:[#allocation2 + $0x10] sm:$0xff] }
  0x38   :  { %168 = vmatpush.xpose.msra.mxu0 %v147_v10  ;;  %1429 = vmatpush.xpose.msra.mxu2 %v147_v10  ;;  %81 = vst.msk [vmem:[#allocation2 + $0x50] sm:$0xff] %vm70_vm3, %v1747_v7 }
  0x39   :  { %1430 = vmatpush.xpose.msra.mxu3 %v147_v10  ;;  %82 = vst.msk [vmem:[#allocation2 + $0x58] sm:$0xff] %vm70_vm3, %v1747_v7 }
  0x3a   :  { %83 = vst.msk [vmem:[#allocation2 + $0x60] sm:$0xff] %vm70_vm3, %v1747_v7 }
  0x3b   :  { %84 = vst.msk [vmem:[#allocation2 + $0x68] sm:$0xff] %vm70_vm3, %v1747_v7 }
  0x3c   :  { %169 = vmatpush.xpose.msra.mxu0 %v146_v11  ;;  %1431 = vmatpush.xpose.msra.mxu2 %v146_v11  ;;  %85 = vst.msk [vmem:[#allocation2 + $0x70] sm:$0xff] %vm70_vm3, %v1747_v7 }
  0x3d   :  { %1432 = vmatpush.xpose.msra.mxu3 %v146_v11  ;;  %v249_v11 = vadd.s32 32, %v1797_v34  ;;  %86 = vst.msk [vmem:[#allocation2 + $0x78] sm:$0xff] %vm70_vm3, %v1747_v7 }
  0x40   :  { %170 = vmatpush.xpose.msra.mxu0 %v145_v12  ;;  %1433 = vmatpush.xpose.msra.mxu2 %v145_v12 }
  0x41   :  { %1434 = vmatpush.xpose.msra.mxu3 %v145_v12 }
  0x44   :  { %171 = vmatpush.xpose.msra.mxu0 %v144_v13  ;;  %1435 = vmatpush.xpose.msra.mxu2 %v144_v13 }
  0x45   :  { %1436 = vmatpush.xpose.msra.mxu3 %v144_v13 }
  0x48   :  { %172 = vmatpush.xpose.msra.mxu0 %v143_v14  ;;  %1437 = vmatpush.xpose.msra.mxu2 %v143_v14 }
  0x49   :  { %1438 = vmatpush.xpose.msra.mxu3 %v143_v14  ;;  %v254_v14 = vadd.s32 72, %v1797_v34 }
  0x4b   :  { %vm287_vm11 = vcmp.ge.s32.totalorder %v254_v14, %v1795_v33 }
  0x4c   :  { %173 = vmatpush.xpose.msra.mxu0 %v142_v15  ;;  %1439 = vmatpush.xpose.msra.mxu2 %v142_v15 }
  0x4d   :  { %1440 = vmatpush.xpose.msra.mxu3 %v142_v15 }
  0x4f   :  { %174 = vmatmul.f32.vlgmr.msra.gmra.mxu0 %v126_v16  ;;  %189 = vmatmul.f32.vlgmr.msra.gmra.mxu2 %v131_v17 }
  0x50   :  { %210 = vmatmul.f32.vlgmr.msra.gmra.mxu3 %v138_v18 }
  0x57   :  { %177 = vmatmul.f32.gmra.mxu0 %v127_v19  ;;  %192 = vmatmul.f32.gmra.mxu2 %v132_v20 }
  0x58   :  { %213 = vmatmul.f32.gmra.mxu3 %v139_v21 }
  0x5f   :  { %180 = vmatmul.f32.gmra.mxu0 %v128_v22  ;;  %195 = vmatmul.f32.gmra.mxu2 %v133_v23 }
  0x60   :  { %216 = vmatmul.f32.gmra.mxu3 %v140_v24  ;;  %v255_v24 = vadd.s32 80, %v1797_v34 }
  0x67   :  { %198 = vmatmul.f32.gmra.mxu2 %v134_v25  ;;  %183 = vmatmul.f32.gmra.mxu0 %v129_v26 }
  0x68   :  { %219 = vmatmul.f32.gmra.mxu3 %v141_v27 }
  0x6f   :  { %201 = vmatmul.f32.gmra.mxu2 %v135_v28  ;;  %186 = vmatmul.f32.gmra.mxu0 %v130_v29 }
  0x77   :  { %204 = vmatmul.f32.gmra.mxu2 %v136_v30  ;;  %v256_v30 = vadd.s32 88, %v1797_v34  ;;  %v1749_v34 = vmov 0.0  }
  0x78   :  { %87 = vst.msk [vmem:[#allocation3] sm:$0xff] %vm70_vm3, %v1749_v34 }
  0x79   :  { %88 = vst.msk [vmem:[#allocation3 + $0x8] sm:$0xff] %vm70_vm3, %v1749_v34 }
  0x7a   :  { %89 = vst.msk [vmem:[#allocation3 + $0x10] sm:$0xff] %vm70_vm3, %v1749_v34 }
  0x7b   :  { %90 = vst.msk [vmem:[#allocation3 + $0x18] sm:$0xff] %vm70_vm3, %v1749_v34 }
  0x7c   :  { %91 = vst.msk [vmem:[#allocation3 + $0x20] sm:$0xff] %vm70_vm3, %v1749_v34 }
  0x7d   :  { %92 = vst.msk [vmem:[#allocation3 + $0x28] sm:$0xff] %vm70_vm3, %v1749_v34 }
  0x7e   :  { %93 = vst.msk [vmem:[#allocation3 + $0x30] sm:$0xff] %vm70_vm3, %v1749_v34 }
  0x7f   :  { %207 = vmatmul.f32.gmra.mxu2 %v137_v31  ;;  %94 = vst.msk [vmem:[#allocation3 + $0x38] sm:$0xff] %vm70_vm3, %v1749_v34 }
  0x80   :  { %95 = vst.msk [vmem:[#allocation3 + $0x40] sm:$0xff] %vm70_vm3, %v1749_v34 }
  0x81   :  { %96 = vst.msk [vmem:[#allocation3 + $0x48] sm:$0xff] %vm70_vm3, %v1749_v34 }
  0x82   :  { %97 = vst.msk [vmem:[#allocation3 + $0x50] sm:$0xff] %vm70_vm3, %v1749_v34 }
  0x83   :  { %98 = vst.msk [vmem:[#allocation3 + $0x58] sm:$0xff] %vm70_vm3, %v1749_v34 }
  0x84   :  { %99 = vst.msk [vmem:[#allocation3 + $0x60] sm:$0xff] %vm70_vm3, %v1749_v34 }
  0x85   :  { %100 = vst.msk [vmem:[#allocation3 + $0x68] sm:$0xff] %vm70_vm3, %v1749_v34 }
  0x86   :  { %101 = vst.msk [vmem:[#allocation3 + $0x70] sm:$0xff] %vm70_vm3, %v1749_v34 }
  0x87   :  { %102 = vst.msk [vmem:[#allocation3 + $0x78] sm:$0xff] %vm70_vm3, %v1749_v34 }
  0xcc   :  { %v175_v36 = vpop.f32.mrf.mxu0 }
  0xcd   :  { %v223_v38 = vmul.f32 0.70710677, %v175_v36 }
  0xcf   :  { %v1806_v39 = vsel %vm295_vm2, %v223_v38, -1e+09  ;;  %vm285_vm2 = vcmp.ge.s32.totalorder %v252_v62, %v1795_v33 }
  0xd0   :  { %343 = vmax.xlane.f32.xlu0 %v1806_v39 }
  0xd2   :  { %v190_v40 = vpop.f32.mrf.mxu2 }
  0xd3   :  { %v228_v41 = vmul.f32 0.70710677, %v190_v40  ;;  %v211_v42 = vpop.f32.mrf.mxu3 }
  0xd4   :  { %v235_v44 = vmul.f32 0.70710677, %v211_v42  ;;  %v178_v45 = vpop.f32.mrf.mxu0  ;;  %v332_v42 = vld [vmem:[#allocation2 + $0x28] sm:$0xff] }
  0xd5   :  { %v1817_v47 = vsel %vm300_vm5, %v228_v41, -1e+09  ;;  %v224_v49 = vmul.f32 0.70710677, %v178_v45  ;;  %vm293_vm5 = vcmp.ge.s32.totalorder %v260_v3, %v1795_v33  ;;  %v339_v45 = vld [vmem:[#allocation2 + $0x60] sm:$0xff] }
  0xd6   :  { %353 = vmax.xlane.f32.xlu2 %v1817_v47  ;;  %v1820_v48 = vsel %vm307_vm6, %v235_v44, -1e+09  ;;  %vm302_vm6 = vmand %vm285_vm2, %vm294_vm1  ;;  %vm289_vm2 = vcmp.ge.s32.totalorder %v256_v30, %v1795_v33 }
  0xd7   :  { %v1832_v57 = vsel %vm296_vm9, %v224_v49, -1e+09  ;;  %vm310_vm8 = vmand %vm293_vm5, %vm294_vm1  ;;  %vm281_vm9 = vcmp.ge.s32.totalorder %v248_v9, %v1795_v33 }
  0xd8   :  { %367 = vmax.xlane.f32.xlu0 %v1820_v48  ;;  %vm298_vm12 = vmand %vm281_vm9, %vm294_vm1 }
  0xd9   :  { %vm306_vm4 = vmand %vm289_vm2, %vm294_vm1 }
  0xda   :  { %v193_v50 = vpop.f32.mrf.mxu2 }
  0xdb   :  { %v214_v52 = vpop.f32.mrf.mxu3  ;;  %v229_v60 = vmul.f32 0.70710677, %v193_v50 }
  0xdc   :  { %v236_v54 = vmul.f32 0.70710677, %v214_v52  ;;  %v181_v55 = vpop.f32.mrf.mxu0  ;;  %v340_v52 = vld [vmem:[#allocation2 + $0x68] sm:$0xff] }
  0xdd   :  { %v225_v59 = vmul.f32 0.70710677, %v181_v55  ;;  %v1852_v5 = vsel %vm301_vm15, %v229_v60, -1e+09  ;;  %vm288_vm15 = vcmp.ge.s32.totalorder %v255_v24, %v1795_v33 }
  0xde   :  { %v1834_v58 = vsel %vm308_vm10, %v236_v54, -1e+09  ;;  %vm282_vm10 = vcmp.ge.s32.totalorder %v249_v11, %v1795_v33  ;;  %v327_v33 = vld [vmem:[#allocation2] sm:$0xff] }
  0xdf   :  { %369 = vmax.xlane.f32.xlu1 %v1834_v58  ;;  %v1849_v1 = vsel %vm297_vm14, %v225_v59, -1e+09  ;;  %vm299_vm13 = vmand %vm282_vm10, %vm294_vm1 }
  0xe0   :  { %345 = vmax.xlane.f32.xlu0 %v1832_v57  ;;  %vm304_vm14 = vmand %vm287_vm11, %vm294_vm1 }
  0xe2   :  { %v196_v61 = vpop.f32.mrf.mxu2 }
  0xe3   :  { %v217_v63 = vpop.f32.mrf.mxu3  ;;  %v230_v8 = vmul.f32 0.70710677, %v196_v61 }
  0xe4   :  { %v237_v2 = vmul.f32 0.70710677, %v217_v63  ;;  %v184_v4 = vpop.f32.mrf.mxu0 }
  0xe5   :  { %v1876_v16 = vsel %vm302_vm6, %v230_v8, -1e+09  ;;  %v226_v20 = vmul.f32 0.70710677, %v184_v4  ;;  %v1957_v8 = vld [vmem:[#allocation2 + $0x70] sm:$0xff] }
  0xe6   :  { %v1854_v6 = vsel %vm309_vm0, %v237_v2, -1e+09  ;;  %vm305_vm0 = vmand %vm288_vm15, %vm294_vm1  ;;  %v333_v2 = vld [vmem:[#allocation2 + $0x30] sm:$0xff] }
  0xe7   :  { %347 = vmax.xlane.f32.xlu1 %v1849_v1  ;;  %371 = vmax.xlane.f32.xlu2 %v1854_v6  ;;  %v1903_v25 = vsel %vm298_vm12, %v226_v20, -1e+09  ;;  %v334_v20 = vld [vmem:[#allocation2 + $0x38] sm:$0xff] }
  0xe8   :  { %355 = vmax.xlane.f32.xlu0 %v1852_v5 }
  0xea   :  { %v199_v10 = vpop.f32.mrf.mxu2 }
  0xeb   :  { %v220_v12 = vpop.f32.mrf.mxu3  ;;  %v231_v13 = vmul.f32 0.70710677, %v199_v10 }
  0xec   :  { %v238_v15 = vmul.f32 0.70710677, %v220_v12  ;;  %v187_v18 = vpop.f32.mrf.mxu0 }
  0xed   :  { %v1879_v17 = vsel %vm303_vm7, %v231_v13, -1e+09  ;;  %v227_v21 = vmul.f32 0.70710677, %v187_v18 }
  0xee   :  { %v1883_v19 = vsel %vm310_vm8, %v238_v15, -1e+09 }
  0xef   :  { %357 = vmax.xlane.f32.xlu1 %v1876_v16  ;;  %359 = vmax.xlane.f32.xlu2 %v1879_v17  ;;  %v1905_v26 = vsel %vm299_vm13, %v227_v21, -1e+09 }
  0xf0   :  { %373 = vmax.xlane.f32.xlu0 %v1883_v19 }
  0xf2   :  { %v202_v22 = vpop.f32.mrf.mxu2 }
  0xf3   :  { %v232_v23 = vmul.f32 0.70710677, %v202_v22 }
  0xf5   :  { %v1908_v27 = vsel %vm304_vm14, %v232_v23, -1e+09  ;;  %v1972_v23 = vld [vmem:[#allocation2 + $0x78] sm:$0xff] }
  0xf7   :  { %349 = vmax.xlane.f32.xlu1 %v1903_v25  ;;  %351 = vmax.xlane.f32.xlu2 %v1905_v26 }
  0xf8   :  { %361 = vmax.xlane.f32.xlu0 %v1908_v27 }
  0xfa   :  { %v205_v28 = vpop.f32.mrf.mxu2 }
  0xfb   :  { %v233_v29 = vmul.f32 0.70710677, %v205_v28  ;;  %v1974_v28 = vld [vmem:[#allocation2 + $0x40] sm:$0xff] }
  0xfd   :  { %v1919_v31 = vsel %vm305_vm0, %v233_v29, -1e+09 }
  0xff   :  { %363 = vmax.xlane.f32.xlu1 %v1919_v31 }
 0x102   :  { %v208_v32 = vpop.f32.mrf.mxu2 }
 0x103   :  { %v234_v35 = vmul.f32 0.70710677, %v208_v32 }
 0x105   :  { %v1925_v36 = vsel %vm306_vm4, %v234_v35, -1e+09 }
 0x106   :  { %365 = vmax.xlane.f32.xlu2 %v1925_v36 }
 0x143   :  { %v344_v38 = vpop.xlane.xlu0 %343 }
 0x144   :  { %v375_v40 = vmax.f32 %v327_v33, %v344_v38 }
 0x146   :  { %v391_v41 = vsub.f32 %v327_v33, %v375_v40  ;;  %889 = vst.msk [vmem:[#allocation2] sm:$0xff] %vm70_vm3, %v375_v40  ;;  %441 = vperm.xlu1 %1483, %v375_v40  }
 0x147   :  { %925 = vst.msk [vmem:[#allocation5] sm:$0xff] %vm70_vm3, %v375_v40  ;;  %v330_v40 = vld [vmem:[#allocation2 + $0x18] sm:$0xff] }
 0x148   :  { %v407_v43 = vmul.f32 1.442695, %v391_v41 }
 0x149   :  { %v354_v44 = vpop.xlane.xlu2 %353 }
 0x14a   :  { %1486 = vpow2.f32 %v407_v43  ;;  %v380_v46 = vmax.f32 %v332_v42, %v354_v44  ;;  %v331_v44 = vld [vmem:[#allocation2 + $0x20] sm:$0xff] }
 0x14b   :  { %v368_v49 = vpop.xlane.xlu0 %367 }
 0x14c   :  { %894 = vst.msk [vmem:[#allocation2 + $0x28] sm:$0xff] %vm70_vm3, %v380_v46  ;;  %v387_v50 = vmax.f32 %v339_v45, %v368_v49  ;;  %466 = vperm.xlu2 %1484, %v380_v46   ;;  %v396_v61 = vsub.f32 %v332_v42, %v380_v46 }
 0x14d   :  { %930 = vst.msk [vmem:[#allocation5 + $0x28] sm:$0xff] %vm70_vm3, %v380_v46 }
 0x14e   :  { %901 = vst.msk [vmem:[#allocation2 + $0x60] sm:$0xff] %vm70_vm3, %v387_v50  ;;  %501 = vperm.xlu0 %1485, %v387_v50   ;;  %v403_v62 = vsub.f32 %v339_v45, %v387_v50  ;;  %v417_v3 = vmul.f32 1.442695, %v396_v61 }
 0x14f   :  { %937 = vst.msk [vmem:[#allocation5 + $0x60] sm:$0xff] %vm70_vm3, %v387_v50 }
 0x150   :  { %v1950_v51 = vpop.eup %1486  ;;  %v431_v9 = vmul.f32 1.442695, %v403_v62 }
 0x151   :  { %682 = vperm.xlu1 %1483, %v1950_v51  }
 0x152   :  { %v370_v54 = vpop.xlane.xlu1 %369 }
 0x153   :  { %v388_v55 = vmax.f32 %v340_v52, %v370_v54  ;;  %v346_v56 = vpop.xlane.xlu0 %345 }
 0x154   :  { %v376_v59 = vmax.f32 %v328_v53, %v346_v56 }
 0x155   :  { %v404_v60 = vsub.f32 %v340_v52, %v388_v55  ;;  %902 = vst.msk [vmem:[#allocation2 + $0x68] sm:$0xff] %vm70_vm3, %v388_v55  ;;  %v2001_v52 = vld [vmem:[#allocation2 + $0x48] sm:$0xff] }
 0x156   :  { %938 = vst.msk [vmem:[#allocation5 + $0x68] sm:$0xff] %vm70_vm3, %v388_v55  ;;  %446 = vperm.xlu2 %1484, %v376_v59   ;;  %v392_v15 = vsub.f32 %v328_v53, %v376_v59 }
 0x157   :  { %890 = vst.msk [vmem:[#allocation2 + $0x8] sm:$0xff] %vm70_vm3, %v376_v59  ;;  %v433_v63 = vmul.f32 1.442695, %v404_v60 }
 0x158   :  { %926 = vst.msk [vmem:[#allocation5 + $0x8] sm:$0xff] %vm70_vm3, %v376_v59  ;;  %v409_v29 = vmul.f32 1.442695, %v392_v15  ;;  %v337_v59 = vld [vmem:[#allocation2 + $0x50] sm:$0xff] }
 0x159   :  { %1488 = vpow2.f32 %v433_v63 }
 0x15a   :  { %v348_v4 = vpop.xlane.xlu1 %347  ;;  %v372_v7 = vpop.xlane.xlu2 %371  ;;  %1490 = vpow2.f32 %v417_v3 }
 0x15b   :  { %v377_v10 = vmax.f32 %v329_v0, %v348_v4  ;;  %v356_v11 = vpop.xlane.xlu0 %355  ;;  %v1961_v14 = vmax.f32 %v1957_v8, %v372_v7  ;;  %1492 = vpow2.f32 %v431_v9 }
 0x15c   :  { %v381_v12 = vmax.f32 %v333_v2, %v356_v11 }
 0x15d   :  { %v393_v13 = vsub.f32 %v329_v0, %v377_v10  ;;  %891 = vst.msk [vmem:[#allocation2 + $0x10] sm:$0xff] %vm70_vm3, %v377_v10  ;;  %451 = vperm.xlu0 %1485, %v377_v10   ;;  %v405_v63 = vsub.f32 %v1957_v8, %v1961_v14  ;;  %v338_v0 = vld [vmem:[#allocation2 + $0x58] sm:$0xff] }
 0x15e   :  { %927 = vst.msk [vmem:[#allocation5 + $0x10] sm:$0xff] %vm70_vm3, %v377_v10  ;;  %506 = vperm.xlu2 %1484, %v388_v55   ;;  %471 = vperm.xlu1 %1483, %v381_v12   ;;  %v397_v38 = vsub.f32 %v333_v2, %v381_v12  ;;  %v791_v8 = vld [vmem:[#allocation11 + $0x78] sm:$0xff] }
 0x15f   :  { %895 = vst.msk [vmem:[#allocation2 + $0x30] sm:$0xff] %vm70_vm3, %v381_v12  ;;  %v411_v18 = vmul.f32 1.442695, %v393_v13  ;;  %v1968_v21 = vpop.eup %1488  ;;  %v435_v7 = vmul.f32 1.442695, %v405_v63  ;;  %792 = vmatpush.msrb.mxu0 %v791_v8  ;;  %1442 = vmatpush.msrb.mxu3 %v791_v8  ;;  %v778_v63 = vld [vmem:[#allocation11 + $0x10] sm:$0xff] }
 0x160   :  { %931 = vst.msk [vmem:[#allocation5 + $0x30] sm:$0xff] %vm70_vm3, %v381_v12  ;;  %v1976_v35 = vpop.eup %1490  ;;  %v419_v45 = vmul.f32 1.442695, %v397_v38  ;;  %1441 = vmatpush.msra.mxu1 %v791_v8 }
 0x161   :  { %903 = vst.msk [vmem:[#allocation2 + $0x70] sm:$0xff] %vm70_vm3, %v1961_v14  ;;  %1494 = vpow2.f32 %v411_v18  ;;  %v1978_v37 = vpop.eup %1492 }
 0x162   :  { %939 = vst.msk [vmem:[#allocation5 + $0x70] sm:$0xff] %vm70_vm3, %v1961_v14  ;;  %v358_v22 = vpop.xlane.xlu1 %357  ;;  %v360_v24 = vpop.xlane.xlu2 %359  ;;  %1496 = vpow2.f32 %v409_v29 }
 0x163   :  { %v382_v30 = vmax.f32 %v334_v20, %v358_v22  ;;  %v374_v32 = vpop.xlane.xlu0 %373  ;;  %v1986_v33 = vmax.f32 %v1974_v28, %v360_v24  ;;  %1498 = vpow2.f32 %v419_v45  ;;  %v790_v24 = vld [vmem:[#allocation11 + $0x70] sm:$0xff] }
 0x164   :  { %v1983_v34 = vmax.f32 %v1972_v23, %v374_v32  ;;  %793 = vmatpush.msrb.mxu0 %v790_v24  ;;  %1444 = vmatpush.msrb.mxu3 %v790_v24 }
 0x165   :  { %747 = vperm.xlu0 %1485, %v1968_v21   ;;  %896 = vst.msk [vmem:[#allocation2 + $0x38] sm:$0xff] %vm70_vm3, %v382_v30  ;;  %v398_v49 = vsub.f32 %v334_v20, %v382_v30  ;;  %v399_v10 = vsub.f32 %v1974_v28, %v1986_v33  ;;  %1443 = vmatpush.msra.mxu1 %v790_v24 }
 0x166   :  { %707 = vperm.xlu2 %1484, %v1976_v35   ;;  %742 = vperm.xlu1 %1483, %v1978_v37   ;;  %932 = vst.msk [vmem:[#allocation5 + $0x38] sm:$0xff] %vm70_vm3, %v382_v30  ;;  %v406_v20 = vsub.f32 %v1972_v23, %v1983_v34 }
 0x167   :  { %904 = vst.msk [vmem:[#allocation2 + $0x78] sm:$0xff] %vm70_vm3, %v1983_v34  ;;  %v1997_v41 = vpop.eup %1494  ;;  %v421_v56 = vmul.f32 1.442695, %v398_v49  ;;  %v423_v13 = vmul.f32 1.442695, %v399_v10 }
 0x168   :  { %940 = vst.msk [vmem:[#allocation5 + $0x78] sm:$0xff] %vm70_vm3, %v1983_v34  ;;  %v2003_v53 = vpop.eup %1496  ;;  %v437_v28 = vmul.f32 1.442695, %v406_v20 }
 0x169   :  { %897 = vst.msk [vmem:[#allocation2 + $0x40] sm:$0xff] %vm70_vm3, %v1986_v33  ;;  %1500 = vpow2.f32 %v421_v56  ;;  %v2021_v62 = vpop.eup %1498  ;;  %v781_v56 = vld [vmem:[#allocation11 + $0x28] sm:$0xff] }
 0x16a   :  { %933 = vst.msk [vmem:[#allocation5 + $0x40] sm:$0xff] %vm70_vm3, %v1986_v33  ;;  %v350_v42 = vpop.xlane.xlu1 %349  ;;  %v352_v43 = vpop.xlane.xlu2 %351  ;;  %1502 = vpow2.f32 %v435_v7 }
 0x16b   :  { %v378_v46 = vmax.f32 %v330_v40, %v350_v42  ;;  %v362_v50 = vpop.xlane.xlu0 %361  ;;  %v379_v54 = vmax.f32 %v331_v44, %v352_v43  ;;  %v786_v43 = vld [vmem:[#allocation11 + $0x50] sm:$0xff] }
 0x16c   :  { %v2012_v55 = vmax.f32 %v2001_v52, %v362_v50  ;;  %v784_v50 = vld [vmem:[#allocation11 + $0x40] sm:$0xff] }
 0x16d   :  { %692 = vperm.xlu0 %1485, %v1997_v41   ;;  %892 = vst.msk [vmem:[#allocation2 + $0x18] sm:$0xff] %vm70_vm3, %v378_v46  ;;  %v395_v9 = vsub.f32 %v331_v44, %v379_v54  ;;  %v394_v11 = vsub.f32 %v330_v40, %v378_v46  ;;  %v787_v40 = vld [vmem:[#allocation11 + $0x58] sm:$0xff] }
 0x16e   :  { %687 = vperm.xlu2 %1484, %v2003_v53   ;;  %511 = vperm.xlu1 %1483, %v1961_v14   ;;  %928 = vst.msk [vmem:[#allocation5 + $0x18] sm:$0xff] %vm70_vm3, %v378_v46  ;;  %v400_v23 = vsub.f32 %v2001_v52, %v2012_v55  ;;  %v783_v52 = vld [vmem:[#allocation11 + $0x38] sm:$0xff] }
 0x16f   :  { %893 = vst.msk [vmem:[#allocation2 + $0x20] sm:$0xff] %vm70_vm3, %v379_v54  ;;  %v2031_v3 = vpop.eup %1500  ;;  %v415_v12 = vmul.f32 1.442695, %v395_v9  ;;  %v413_v14 = vmul.f32 1.442695, %v394_v11 }
 0x170   :  { %929 = vst.msk [vmem:[#allocation5 + $0x20] sm:$0xff] %vm70_vm3, %v379_v54  ;;  %v2044_v18 = vpop.eup %1502  ;;  %v425_v42 = vmul.f32 1.442695, %v400_v23 }
 0x171   :  { %898 = vst.msk [vmem:[#allocation2 + $0x48] sm:$0xff] %vm70_vm3, %v2012_v55  ;;  %1504 = vpow2.f32 %v415_v12 }
 0x172   :  { %934 = vst.msk [vmem:[#allocation5 + $0x48] sm:$0xff] %vm70_vm3, %v2012_v55  ;;  %v364_v60 = vpop.xlane.xlu1 %363  ;;  %1506 = vpow2.f32 %v423_v13 }
 0x173   :  { %v2019_v61 = vmax.f32 %v337_v59, %v364_v60  ;;  %1508 = vpow2.f32 %v413_v14  ;;  %v780_v60 = vld [vmem:[#allocation11 + $0x20] sm:$0xff] }
 0x175   :  { %516 = vperm.xlu0 %1485, %v1983_v34   ;;  %899 = vst.msk [vmem:[#allocation2 + $0x50] sm:$0xff] %vm70_vm3, %v2019_v61  ;;  %v401_v15 = vsub.f32 %v337_v59, %v2019_v61  ;;  %v788_v34 = vld [vmem:[#allocation11 + $0x60] sm:$0xff] }
 0x176   :  { %476 = vperm.xlu2 %1484, %v382_v30   ;;  %712 = vperm.xlu1 %1483, %v2021_v62   ;;  %935 = vst.msk [vmem:[#allocation5 + $0x50] sm:$0xff] %vm70_vm3, %v2019_v61  ;;  %v789_v30 = vld [vmem:[#allocation11 + $0x68] sm:$0xff] }
 0x177   :  { %v427_v22 = vmul.f32 1.442695, %v401_v15  ;;  %v2050_v29 = vpop.eup %1504  ;;  %794 = vmatpush.msrb.mxu0 %v789_v30  ;;  %1446 = vmatpush.msrb.mxu3 %v789_v30 }
 0x178   :  { %v2052_v32 = vpop.eup %1506  ;;  %1445 = vmatpush.msra.mxu1 %v789_v30 }
 0x179   :  { %v366_v2 = vpop.xlane.xlu2 %365  ;;  %1510 = vpow2.f32 %v427_v22  ;;  %795 = vmatpush.msrb.mxu0 %v788_v34  ;;  %1448 = vmatpush.msrb.mxu3 %v788_v34 }
 0x17a   :  { %v2033_v4 = vmax.f32 %v338_v0, %v366_v2  ;;  %1512 = vpow2.f32 %v437_v28  ;;  %1447 = vmatpush.msra.mxu1 %v788_v34  ;;  %v776_v2 = vld [vmem:[#allocation11] sm:$0xff] }
 0x17b   :  { %796 = vmatpush.msrb.mxu0 %v787_v40  ;;  %1450 = vmatpush.msrb.mxu3 %v787_v40  ;;  %1514 = vpow2.f32 %v425_v42 }
 0x17c   :  { %900 = vst.msk [vmem:[#allocation2 + $0x58] sm:$0xff] %vm70_vm3, %v2033_v4  ;;  %v402_v38 = vsub.f32 %v338_v0, %v2033_v4  ;;  %1449 = vmatpush.msra.mxu1 %v787_v40  ;;  %v777_v0 = vld [vmem:[#allocation11 + $0x8] sm:$0xff] }
 0x17d   :  { %717 = vperm.xlu0 %1485, %v2031_v3   ;;  %936 = vst.msk [vmem:[#allocation5 + $0x58] sm:$0xff] %vm70_vm3, %v2033_v4  ;;  %797 = vmatpush.msrb.mxu0 %v786_v43 }
 0x17e   :  { %456 = vperm.xlu2 %1484, %v378_v46   ;;  %481 = vperm.xlu1 %1483, %v1986_v33   ;;  %v2056_v33 = vpop.eup %1508  ;;  %v429_v44 = vmul.f32 1.442695, %v402_v38  ;;  %v785_v46 = vld [vmem:[#allocation11 + $0x48] sm:$0xff] }
 0x17f   :  { %v2062_v45 = vpop.eup %1510  ;;  %1452 = vmatpush.msrb.mxu3 %v786_v43  ;;  %798 = vmatpush.msrb.mxu0 %v785_v46 }
 0x180   :  { %v2064_v49 = vpop.eup %1512  ;;  %1451 = vmatpush.msra.mxu1 %v786_v43  ;;  %1516 = vpow2.f32 %v429_v44 }
 0x181   :  { %1454 = vmatpush.msrb.mxu3 %v785_v46  ;;  %799 = vmatpush.msrb.mxu0 %v784_v50 }
 0x182   :  { %1453 = vmatpush.msra.mxu1 %v785_v46 }
 0x183   :  { %1456 = vmatpush.msrb.mxu3 %v784_v50  ;;  %800 = vmatpush.msrb.mxu0 %v783_v52 }
 0x184   :  { %1455 = vmatpush.msra.mxu1 %v784_v50 }
 0x185   :  { %486 = vperm.xlu0 %1485, %v2012_v55   ;;  %1458 = vmatpush.msrb.mxu3 %v783_v52  ;;  %v2069_v55 = vpop.eup %1514 }
 0x186   :  { %752 = vperm.xlu2 %1484, %v2044_v18   ;;  %461 = vperm.xlu1 %1483, %v379_v54   ;;  %v782_v54 = vld [vmem:[#allocation11 + $0x30] sm:$0xff]  ;;  %v2071_v59 = vpop.eup %1516 }
 0x187   :  { %801 = vmatpush.msrb.mxu0 %v782_v54  ;;  %1460 = vmatpush.msrb.mxu3 %v782_v54 }
 0x188   :  { %1457 = vmatpush.msra.mxu1 %v783_v52 }
 0x189   :  { %802 = vmatpush.msrb.mxu0 %v781_v56  ;;  %1462 = vmatpush.msrb.mxu3 %v781_v56 }
 0x18a   :  { %1459 = vmatpush.msra.mxu1 %v782_v54 }
 0x18b   :  { %803 = vmatpush.msrb.mxu0 %v780_v60  ;;  %1464 = vmatpush.msrb.mxu3 %v780_v60 }
 0x18c   :  { %1461 = vmatpush.msra.mxu1 %v781_v56 }
 0x18d   :  { %702 = vperm.xlu0 %1485, %v2050_v29  }
 0x18e   :  { %722 = vperm.xlu2 %1484, %v2052_v32   ;;  %697 = vperm.xlu1 %1483, %v2056_v33  }
 0x18f   :  { %1463 = vmatpush.msra.mxu1 %v780_v60 }
 0x195   :  { %732 = vperm.xlu0 %1485, %v2062_v45  }
 0x196   :  { %491 = vperm.xlu2 %1484, %v2019_v61   ;;  %757 = vperm.xlu1 %1483, %v2064_v49   ;;  %v779_v61 = vld [vmem:[#allocation11 + $0x18] sm:$0xff] }
 0x197   :  { %804 = vmatpush.msrb.mxu0 %v779_v61  ;;  %1466 = vmatpush.msrb.mxu3 %v779_v61 }
 0x198   :  { %1465 = vmatpush.msra.mxu1 %v779_v61 }
 0x199   :  { %805 = vmatpush.msrb.mxu0 %v778_v63  ;;  %1468 = vmatpush.msrb.mxu3 %v778_v63 }
 0x19a   :  { %1467 = vmatpush.msra.mxu1 %v778_v63 }
 0x19b   :  { %806 = vmatpush.msrb.mxu0 %v777_v0  ;;  %1470 = vmatpush.msrb.mxu3 %v777_v0 }
 0x19c   :  { %1469 = vmatpush.msra.mxu1 %v777_v0 }
 0x19d   :  { %807 = vmatpush.msrb.mxu0 %v776_v2  ;;  %1472 = vmatpush.msrb.mxu3 %v776_v2 }
 0x19e   :  { %737 = vperm.xlu2 %1484, %v2071_v59   ;;  %727 = vperm.xlu1 %1483, %v2069_v55  }
 0x19f   :  { %1471 = vmatpush.msra.mxu1 %v776_v2 }
 0x1a6   :  { %v467_v7 = vpop.permute.xlu2 %466  ;;  %496 = vperm.xlu1 %1483, %v2033_v4  }
 0x1a7   :  { %v524_v9 = vsub.f32 %v1817_v47, %v467_v7 }
 0x1a9   :  { %v545_v10 = vmul.f32 1.442695, %v524_v9 }
 0x1ab   :  { %1518 = vpow2.f32 %v545_v10 }
 0x1b0   :  { %v447_v8 = vpop.permute.xlu2 %446 }
 0x1b1   :  { %v2077_v11 = vpop.eup %1518  ;;  %v520_v20 = vsub.f32 %v1832_v57, %v447_v8 }
 0x1b2   :  { %913 = vst [vmem:[#allocation13 + $0x28] sm:$0xff] %v2077_v11 }
 0x1b3   :  { %v537_v30 = vmul.f32 1.442695, %v520_v20 }
 0x1b8   :  { %v507_v12 = vpop.permute.xlu2 %506  ;;  %v442_v13 = vpop.permute.xlu1 %441 }
 0x1b9   :  { %v532_v14 = vsub.f32 %v1834_v58, %v507_v12  ;;  %v519_v4 = vsub.f32 %v1806_v39, %v442_v13 }
 0x1bb   :  { %v561_v15 = vmul.f32 1.442695, %v532_v14  ;;  %v535_v47 = vmul.f32 1.442695, %v519_v4 }
 0x1bd   :  { %1520 = vpow2.f32 %v561_v15 }
 0x1be   :  { %1522 = vpow2.f32 %v535_v47 }
 0x1c0   :  { %v502_v22 = vpop.permute.xlu0 %501  ;;  %v2083_v24 = vpop.permute.xlu2 %707 }
 0x1c1   :  { %v531_v28 = vsub.f32 %v1820_v48, %v502_v22 }
 0x1c3   :  { %v1521_v23 = vpop.eup %1520  ;;  %v559_v34 = vmul.f32 1.442695, %v531_v28  ;;  %v2090_v39 = vpop.permute.xlu1 %682 }
 0x1c4   :  { %v2086_v38 = vpop.eup %1522  ;;  %921 = vst [vmem:[#allocation13 + $0x68] sm:$0xff] %v1521_v23  ;;  %847 = vmatmul.f32.vlgmr.msrb.gmra.mxu3 %v1521_v23 }
 0x1c5   :  { %1524 = vpow2.f32 %v559_v34  ;;  %808 = vmatmul.f32.vlgmr.msrb.gmra.mxu0 %v2086_v38 }
 0x1c6   :  { %1526 = vpow2.f32 %v537_v30 }
 0x1c7   :  { %599 = vadd.xlane.f32.xlu2 %v2086_v38 }
 0x1c8   :  { %v2092_v57 = vpop.permute.xlu2 %687 }
 0x1cb   :  { %v2094_v58 = vpop.eup %1524 }
 0x1cc   :  { %v2096_v48 = vpop.eup %1526  ;;  %623 = vadd.xlane.f32.xlu0 %v2094_v58 }
 0x1cd   :  { %811 = vmatmul.f32.gmra.mxu0 %v2096_v48 }
 0x1cf   :  { %v452_v40 = vpop.permute.xlu0 %451  ;;  %609 = vadd.xlane.f32.xlu2 %v2077_v11 }
 0x1d0   :  { %v521_v42 = vsub.f32 %v1849_v1, %v452_v40  ;;  %v477_v43 = vpop.permute.xlu2 %476  ;;  %601 = vadd.xlane.f32.xlu1 %v2096_v48  ;;  %v472_v44 = vpop.permute.xlu1 %471 }
 0x1d1   :  { %v526_v46 = vsub.f32 %v1876_v16, %v477_v43  ;;  %v525_v50 = vsub.f32 %v1852_v5, %v472_v44 }
 0x1d2   :  { %v539_v52 = vmul.f32 1.442695, %v521_v42 }
 0x1d3   :  { %v547_v54 = vmul.f32 1.442695, %v525_v50  ;;  %v549_v56 = vmul.f32 1.442695, %v526_v46 }
 0x1d4   :  { %1528 = vpow2.f32 %v539_v52 }
 0x1d5   :  { %1530 = vpow2.f32 %v547_v54 }
 0x1d6   :  { %1532 = vpow2.f32 %v549_v56 }
 0x1d7   :  { %v2105_v60 = vpop.permute.xlu0 %747 }
 0x1d8   :  { %v457_v61 = vpop.permute.xlu2 %456  ;;  %625 = vadd.xlane.f32.xlu1 %v1521_v23  ;;  %v2107_v63 = vpop.permute.xlu1 %742 }
 0x1d9   :  { %v522_v1 = vsub.f32 %v1903_v25, %v457_v61 }
 0x1da   :  { %v2110_v0 = vpop.eup %1528 }
 0x1db   :  { %v541_v2 = vmul.f32 1.442695, %v522_v1  ;;  %814 = vmatmul.f32.vlgmr.msra.gmra.mxu1 %v2110_v0  ;;  %v2113_v5 = vpop.eup %1530 }
 0x1dc   :  { %611 = vadd.xlane.f32.xlu0 %v2113_v5  ;;  %v2116_v16 = vpop.eup %1532 }
 0x1dd   :  { %1534 = vpow2.f32 %v541_v2 }
 0x1df   :  { %v2118_v7 = vpop.permute.xlu0 %692 }
 0x1e0   :  { %613 = vadd.xlane.f32.xlu1 %v2116_v16  ;;  %v512_v9 = vpop.permute.xlu1 %511  ;;  %v2126_v12 = vpop.permute.xlu2 %752 }
 0x1e1   :  { %v533_v10 = vsub.f32 %v1854_v6, %v512_v9 }
 0x1e3   :  { %v2122_v25 = vpop.eup %1534  ;;  %v563_v8 = vmul.f32 1.442695, %v533_v10 }
 0x1e4   :  { %817 = vmatmul.f32.gmra.mxu1 %v2122_v25  ;;  %603 = vadd.xlane.f32.xlu0 %v2110_v0 }
 0x1e5   :  { %1536 = vpow2.f32 %v563_v8 }
 0x1e7   :  { %v517_v13 = vpop.permute.xlu0 %516 }
 0x1e8   :  { %v534_v14 = vsub.f32 %v1883_v19, %v517_v13  ;;  %v2129_v4 = vpop.permute.xlu1 %712  ;;  %v2137_v20 = vpop.permute.xlu2 %722  ;;  %v567_v13 = vld [vmem:[#allocation3] sm:$0xff] }
 0x1ea   :  { %v565_v15 = vmul.f32 1.442695, %v534_v14  ;;  %v583_v14 = vmul.f32 %v1950_v51, %v567_v13 }
 0x1eb   :  { %v2131_v47 = vpop.eup %1536 }
 0x1ec   :  { %1538 = vpow2.f32 %v565_v15  ;;  %627 = vadd.xlane.f32.xlu2 %v2131_v47  ;;  %850 = vmatmul.f32.gmra.mxu3 %v2131_v47  ;;  %v985_v15 = vld [vmem:[#allocation2] sm:$0xff] }
 0x1ef   :  { %v2135_v6 = vpop.permute.xlu0 %717 }
 0x1f0   :  { %v482_v22 = vpop.permute.xlu1 %481  ;;  %v492_v43 = vpop.permute.xlu2 %491 }
 0x1f1   :  { %v527_v28 = vsub.f32 %v1879_v17, %v482_v22  ;;  %v529_v50 = vsub.f32 %v1919_v31, %v492_v43  ;;  %v1161_v22 = vld [vmem:[#allocation5] sm:$0xff] }
 0x1f2   :  { %v2140_v30 = vpop.eup %1538 }
 0x1f3   :  { %v551_v19 = vmul.f32 1.442695, %v527_v28  ;;  %629 = vadd.xlane.f32.xlu0 %v2140_v30  ;;  %v555_v54 = vmul.f32 1.442695, %v529_v50 }
 0x1f4   :  { %605 = vadd.xlane.f32.xlu2 %v2122_v25  ;;  %853 = vmatmul.f32.gmra.mxu3 %v2140_v30 }
 0x1f5   :  { %1540 = vpow2.f32 %v551_v19 }
 0x1f7   :  { %v487_v23 = vpop.permute.xlu0 %486 }
 0x1f8   :  { %v528_v34 = vsub.f32 %v1908_v27, %v487_v23  ;;  %v462_v40 = vpop.permute.xlu1 %461  ;;  %v2178_v8 = vpop.permute.xlu2 %737  ;;  %v579_v23 = vld [vmem:[#allocation3 + $0x60] sm:$0xff] }
 0x1f9   :  { %v523_v42 = vsub.f32 %v1905_v26, %v462_v40  ;;  %v595_v40 = vmul.f32 %v1978_v37, %v579_v23  ;;  %v580_v37 = vld [vmem:[#allocation3 + $0x68] sm:$0xff] }
 0x1fa   :  { %v553_v44 = vmul.f32 1.442695, %v528_v34  ;;  %v1177_v34 = vsub.f32 %v1161_v22, %v985_v15  ;;  %v990_v15 = vld [vmem:[#allocation2 + $0x28] sm:$0xff] }
 0x1fb   :  { %v543_v46 = vmul.f32 1.442695, %v523_v42  ;;  %v2147_v17 = vpop.eup %1540  ;;  %v572_v42 = vld [vmem:[#allocation3 + $0x28] sm:$0xff] }
 0x1fc   :  { %1542 = vpow2.f32 %v553_v44  ;;  %615 = vadd.xlane.f32.xlu2 %v2147_v17  ;;  %v568_v44 = vld [vmem:[#allocation3 + $0x8] sm:$0xff]  ;;  %v1193_v50 = vmul.f32 1.442695, %v1177_v34 }
 0x1fd   :  { %1544 = vpow2.f32 %v543_v46  ;;  %v986_v22 = vld [vmem:[#allocation2 + $0x8] sm:$0xff] }
 0x1fe   :  { %1546 = vpow2.f32 %v555_v54  ;;  %v588_v54 = vmul.f32 %v1976_v35, %v572_v42  ;;  %v1166_v35 = vld [vmem:[#allocation5 + $0x28] sm:$0xff]  ;;  %v1173_v42 = vld [vmem:[#allocation5 + $0x60] sm:$0xff] }
 0x1ff   :  { %v1182_v34 = vsub.f32 %v1166_v35, %v990_v15 }
 0x200   :  { %v2151_v52 = vpop.permute.xlu1 %697 }
 0x202   :  { %v2153_v56 = vpop.eup %1542 }
 0x203   :  { %v2155_v27 = vpop.eup %1544  ;;  %617 = vadd.xlane.f32.xlu0 %v2153_v56 }
 0x204   :  { %607 = vadd.xlane.f32.xlu1 %v2155_v27  ;;  %820 = vmatmul.f32.gmra.mxu1 %v2155_v27  ;;  %v2162_v31 = vpop.eup %1546 }
 0x208   :  { %v2160_v26 = vpop.permute.xlu1 %757 }
 0x20c   :  { %619 = vadd.xlane.f32.xlu1 %v2162_v31  ;;  %823 = vmatmul.f32.gmra.mxu1 %v2077_v11  ;;  %v2176_v11 = vpop.permute.xlu0 %702 }
 0x210   :  { %v2166_v61 = vpop.permute.xlu1 %727 }
 0x214   :  { %826 = vmatmul.f32.gmra.mxu1 %v2113_v5 }
 0x218   :  { %v497_v1 = vpop.permute.xlu1 %496 }
 0x219   :  { %v530_v2 = vsub.f32 %v1925_v36, %v497_v1  ;;  %v2181_v36 = vpop.permute.xlu0 %732  ;;  %v584_v1 = vmul.f32 %v2003_v53, %v568_v44  ;;  %v596_v53 = vmul.f32 %v1968_v21, %v580_v37  ;;  %v1203_v21 = vmul.f32 1.442695, %v1182_v34  ;;  %v569_v34 = vld [vmem:[#allocation3 + $0x10] sm:$0xff] }
 0x21b   :  { %v557_v9 = vmul.f32 1.442695, %v530_v2 }
 0x21c   :  { %829 = vmatmul.f32.gmra.mxu1 %v2116_v16 }
 0x21d   :  { %1548 = vpow2.f32 %v557_v9 }
 0x21e   :  { %1550 = vpow2.f32 %v1193_v50 }
 0x223   :  { %v2171_v10 = vpop.eup %1548 }
 0x224   :  { %832 = vmatmul.f32.gmra.mxu1 %v2147_v17  ;;  %621 = vadd.xlane.f32.xlu2 %v2171_v10  ;;  %v1551_v23 = vpop.eup %1550 }
 0x22c   :  { %835 = vmatmul.f32.gmra.mxu1 %v2153_v56 }
 0x234   :  { %838 = vmatmul.f32.gmra.mxu1 %v2162_v31 }
 0x23a   :  { %v600_v28 = vpop.xlane.xlu2 %599 }
 0x23b   :  { %v631_v19 = vadd.f32 %v600_v28, %v583_v14  ;;  %v1162_v28 = vld [vmem:[#allocation5 + $0x8] sm:$0xff] }
 0x23c   :  { %841 = vmatmul.f32.gmra.mxu1 %v2171_v10 }
 0x23d   :  { %648 = vst.msk [vmem:[#allocation3] sm:$0xff] %vm70_vm3, %v631_v19 }
 0x23f   :  { %v624_v43 = vpop.xlane.xlu0 %623 }
 0x240   :  { %v643_v46 = vadd.f32 %v624_v43, %v595_v40  ;;  %v997_v40 = vld [vmem:[#allocation2 + $0x60] sm:$0xff] }
 0x242   :  { %660 = vst.msk [vmem:[#allocation3 + $0x60] sm:$0xff] %vm70_vm3, %v643_v46  ;;  %v610_v51 = vpop.xlane.xlu2 %609  ;;  %v1178_v46 = vsub.f32 %v1162_v28, %v986_v22 }
 0x243   :  { %v636_v2 = vadd.f32 %v610_v51, %v588_v54  ;;  %v602_v9 = vpop.xlane.xlu1 %601  ;;  %v573_v51 = vld [vmem:[#allocation3 + $0x30] sm:$0xff] }
 0x244   :  { %v632_v13 = vadd.f32 %v602_v9, %v584_v1  ;;  %844 = vmatmul.f32.gmra.mxu1 %v2094_v58  ;;  %v1001_v14 = vld [vmem:[#allocation3] sm:$0xff]  ;;  %v1189_v9 = vsub.f32 %v1173_v42, %v997_v40  ;;  %v1195_v37 = vmul.f32 1.442695, %v1178_v46 }
 0x245   :  { %653 = vst.msk [vmem:[#allocation3 + $0x28] sm:$0xff] %vm70_vm3, %v636_v2  ;;  %1552 = vrcp.f32 %v1001_v14  ;;  %v574_v14 = vld [vmem:[#allocation3 + $0x38] sm:$0xff] }
 0x246   :  { %649 = vst.msk [vmem:[#allocation3 + $0x8] sm:$0xff] %vm70_vm3, %v632_v13  ;;  %v589_v13 = vmul.f32 %v2021_v62, %v573_v51  ;;  %v1217_v22 = vmul.f32 1.442695, %v1189_v9  ;;  %v762_v62 = vmul.f32 0.0, %v2118_v7  ;;  %v581_v7 = vld [vmem:[#allocation3 + $0x70] sm:$0xff] }
 0x249   :  { %v1013_v19 = vld [vmem:[#allocation3 + $0x60] sm:$0xff] }
 0x24a   :  { %1554 = vrcp.f32 %v1013_v19 }
 0x24b   :  { %v1553_v43 = vpop.eup %1552  ;;  %v626_v44 = vpop.xlane.xlu1 %625 }
 0x24c   :  { %v644_v50 = vadd.f32 %v626_v44, %v596_v53  ;;  %1051 = vperm.xlu0 %1485, %v1553_v43   ;;  %v1225_v54 = vmul.f32 %v1553_v43, %v1551_v23  ;;  %v1006_v1 = vld [vmem:[#allocation3 + $0x28] sm:$0xff]  ;;  %v590_v23 = vmul.f32 %v2031_v3, %v574_v14  ;;  %v585_v43 = vmul.f32 %v1997_v41, %v569_v34  ;;  %v987_v3 = vld [vmem:[#allocation2 + $0x10] sm:$0xff] }
 0x24d   :  { %1556 = vrcp.f32 %v1006_v1  ;;  %v1002_v2 = vld [vmem:[#allocation3 + $0x8] sm:$0xff]  ;;  %v1163_v44 = vld [vmem:[#allocation5 + $0x10] sm:$0xff] }
 0x24e   :  { %661 = vst.msk [vmem:[#allocation3 + $0x68] sm:$0xff] %vm70_vm3, %v644_v50  ;;  %1259 = vperm.xlu2 %1484, %v1225_v54   ;;  %1558 = vrcp.f32 %v1002_v2  ;;  %v1179_v14 = vsub.f32 %v1163_v44, %v987_v3  ;;  %v582_v44 = vld [vmem:[#allocation3 + $0x78] sm:$0xff] }
 0x24f   :  { %v612_v15 = vpop.xlane.xlu0 %611  ;;  %1560 = vpow2.f32 %v1203_v21 }
 0x250   :  { %v637_v35 = vadd.f32 %v612_v15, %v589_v13  ;;  %v1555_v28 = vpop.eup %1554  ;;  %1562 = vpow2.f32 %v1195_v37  ;;  %v991_v37 = vld [vmem:[#allocation2 + $0x30] sm:$0xff] }
 0x251   :  { %1564 = vpow2.f32 %v1217_v22  ;;  %v1167_v15 = vld [vmem:[#allocation5 + $0x30] sm:$0xff] }
 0x252   :  { %654 = vst.msk [vmem:[#allocation3 + $0x30] sm:$0xff] %vm70_vm3, %v637_v35 }
 0x253   :  { %v1557_v19 = vpop.eup %1556  ;;  %v614_v53 = vpop.xlane.xlu1 %613 }
 0x254   :  { %v1559_v40 = vpop.eup %1558  ;;  %v638_v42 = vadd.f32 %v614_v53, %v590_v23  ;;  %1076 = vperm.xlu1 %1483, %v1557_v19   ;;  %1111 = vperm.xlu0 %1485, %v1555_v28   ;;  %v1183_v23 = vsub.f32 %v1167_v15, %v991_v37  ;;  %v597_v53 = vmul.f32 %v2044_v18, %v581_v7 }
 0x255   :  { %v1561_v46 = vpop.eup %1560  ;;  %v1014_v22 = vld [vmem:[#allocation3 + $0x68] sm:$0xff] }
 0x256   :  { %655 = vst.msk [vmem:[#allocation3 + $0x38] sm:$0xff] %vm70_vm3, %v638_v42  ;;  %1056 = vperm.xlu2 %1484, %v1559_v40   ;;  %v1563_v51 = vpop.eup %1562  ;;  %v1230_v21 = vmul.f32 %v1561_v46, %v1557_v19  ;;  %v1197_v42 = vmul.f32 1.442695, %v1179_v14  ;;  %v763_v19 = vmul.f32 0.0, %v2151_v52 }
 0x257   :  { %v604_v54 = vpop.xlane.xlu0 %603  ;;  %v1226_v9 = vmul.f32 %v1563_v51, %v1559_v40  ;;  %v1565_v35 = vpop.eup %1564 }
 0x258   :  { %v815_v50 = vpop.f32.mrf.mxu1  ;;  %v633_v2 = vadd.f32 %v604_v54, %v585_v43  ;;  %v1237_v41 = vmul.f32 %v1565_v35, %v1555_v28  ;;  %v1205_v43 = vmul.f32 1.442695, %v1183_v23  ;;  %v598_v54 = vmul.f32 %v2064_v49, %v582_v44 }
 0x259   :  { %v2201_v1 = vadd.f32 %v815_v50, %v762_v62  ;;  %v1007_v13 = vld [vmem:[#allocation3 + $0x30] sm:$0xff]  ;;  %v570_v50 = vld [vmem:[#allocation3 + $0x18] sm:$0xff] }
 0x25a   :  { %650 = vst.msk [vmem:[#allocation3 + $0x10] sm:$0xff] %vm70_vm3, %v633_v2  ;;  %1566 = vrcp.f32 %v1007_v13  ;;  %v586_v51 = vmul.f32 %v2056_v33, %v570_v50  ;;  %v992_v2 = vld [vmem:[#allocation2 + $0x38] sm:$0xff] }
 0x25b   :  { %1568 = vrcp.f32 %v1014_v22  ;;  %v1164_v22 = vld [vmem:[#allocation5 + $0x18] sm:$0xff] }
 0x25c   :  { %1264 = vperm.xlu1 %1483, %v1226_v9   ;;  %1284 = vperm.xlu0 %1485, %v1230_v21   ;;  %1570 = vpow2.f32 %v1197_v42  ;;  %v1168_v9 = vld [vmem:[#allocation5 + $0x38] sm:$0xff] }
 0x25d   :  { %v1184_v7 = vsub.f32 %v1168_v9, %v992_v2  ;;  %v1008_v42 = vld [vmem:[#allocation3 + $0x38] sm:$0xff]  ;;  %v1169_v2 = vld [vmem:[#allocation5 + $0x40] sm:$0xff] }
 0x25e   :  { %1319 = vperm.xlu2 %1484, %v1237_v41   ;;  %v988_v41 = vld [vmem:[#allocation2 + $0x18] sm:$0xff] }
 0x25f   :  { %v628_v40 = vpop.xlane.xlu2 %627 }
 0x260   :  { %v645_v34 = vadd.f32 %v628_v40, %v597_v53  ;;  %v1567_v46 = vpop.eup %1566  ;;  %v575_v53 = vld [vmem:[#allocation3 + $0x40] sm:$0xff]  ;;  %v1207_v40 = vmul.f32 1.442695, %v1184_v7 }
 0x261   :  { %v818_v62 = vpop.f32.mrf.mxu1  ;;  %v1003_v28 = vld [vmem:[#allocation3 + $0x10] sm:$0xff]  ;;  %v2209_v18 = vpop.eup %1568 }
 0x262   :  { %662 = vst.msk [vmem:[#allocation3 + $0x70] sm:$0xff] %vm70_vm3, %v645_v34  ;;  %v2207_v3 = vadd.f32 %v818_v62, %v763_v19  ;;  %1572 = vrcp.f32 %v1003_v28  ;;  %v1571_v14 = vpop.eup %1570  ;;  %v1180_v19 = vsub.f32 %v1164_v22, %v988_v41  ;;  %v591_v34 = vmul.f32 %v2052_v32, %v575_v53  ;;  %v993_v32 = vld [vmem:[#allocation2 + $0x40] sm:$0xff]  ;;  %v577_v53 = vld [vmem:[#allocation3 + $0x50] sm:$0xff] }
 0x263   :  { %1574 = vpow2.f32 %v1205_v43 }
 0x264   :  { %1081 = vperm.xlu0 %1485, %v1567_v46   ;;  %v1199_v50 = vmul.f32 1.442695, %v1180_v19 }
 0x266   :  { %v630_v52 = vpop.xlane.xlu0 %629  ;;  %1116 = vperm.xlu2 %1484, %v2209_v18  }
 0x267   :  { %v646_v21 = vadd.f32 %v630_v52, %v598_v54  ;;  %v606_v13 = vpop.xlane.xlu2 %605  ;;  %v576_v54 = vld [vmem:[#allocation3 + $0x48] sm:$0xff] }
 0x268   :  { %v634_v37 = vadd.f32 %v606_v13, %v586_v51  ;;  %v1573_v15 = vpop.eup %1572  ;;  %v592_v51 = vmul.f32 %v2069_v55, %v576_v54  ;;  %v989_v13 = vld [vmem:[#allocation2 + $0x20] sm:$0xff] }
 0x269   :  { %663 = vst.msk [vmem:[#allocation3 + $0x78] sm:$0xff] %vm70_vm3, %v646_v21  ;;  %v1015_v35 = vld [vmem:[#allocation3 + $0x70] sm:$0xff]  ;;  %1061 = vperm.xlu1 %1483, %v1573_v15   ;;  %v1227_v49 = vmul.f32 %v1573_v15, %v1571_v14  ;;  %v1575_v23 = vpop.eup %1574  ;;  %v1165_v14 = vld [vmem:[#allocation5 + $0x20] sm:$0xff] }
 0x26a   :  { %651 = vst.msk [vmem:[#allocation3 + $0x18] sm:$0xff] %vm70_vm3, %v634_v37  ;;  %1576 = vrcp.f32 %v1015_v35  ;;  %v1231_v33 = vmul.f32 %v1575_v23, %v1567_v46  ;;  %v571_v46 = vld [vmem:[#allocation3 + $0x20] sm:$0xff]  ;;  %v1185_v23 = vsub.f32 %v1169_v2, %v993_v32  ;;  %v1181_v55 = vsub.f32 %v1165_v14, %v989_v13 }
 0x26b   :  { %1578 = vrcp.f32 %v1008_v42  ;;  %v587_v21 = vmul.f32 %v2050_v29, %v571_v46 }
 0x26c   :  { %1269 = vperm.xlu0 %1485, %v1227_v49   ;;  %1580 = vpow2.f32 %v1207_v40  ;;  %v1209_v40 = vmul.f32 1.442695, %v1185_v23  ;;  %v1201_v19 = vmul.f32 1.442695, %v1181_v55 }
 0x26e   :  { %1289 = vperm.xlu2 %1484, %v1231_v33  }
 0x26f   :  { %v616_v43 = vpop.xlane.xlu2 %615 }
 0x270   :  { %v2217_v62 = vpop.eup %1576  ;;  %v639_v44 = vadd.f32 %v616_v43, %v591_v34  ;;  %v1016_v7 = vld [vmem:[#allocation3 + $0x78] sm:$0xff]  ;;  %v994_v34 = vld [vmem:[#allocation2 + $0x48] sm:$0xff] }
 0x271   :  { %v1004_v28 = vld [vmem:[#allocation3 + $0x18] sm:$0xff]  ;;  %1121 = vperm.xlu1 %1483, %v2217_v62   ;;  %v1579_v52 = vpop.eup %1578  ;;  %v1170_v43 = vld [vmem:[#allocation5 + $0x48] sm:$0xff] }
 0x272   :  { %1582 = vrcp.f32 %v1004_v28  ;;  %656 = vst.msk [vmem:[#allocation3 + $0x40] sm:$0xff] %vm70_vm3, %v639_v44  ;;  %v1581_v37 = vpop.eup %1580  ;;  %v593_v44 = vmul.f32 %v2062_v45, %v577_v53  ;;  %v995_v28 = vld [vmem:[#allocation2 + $0x50] sm:$0xff]  ;;  %v1186_v32 = vsub.f32 %v1170_v43, %v994_v34 }
 0x273   :  { %1584 = vpow2.f32 %v1199_v50  ;;  %v1232_v22 = vmul.f32 %v1581_v37, %v1579_v52  ;;  %v1171_v50 = vld [vmem:[#allocation5 + $0x50] sm:$0xff] }
 0x274   :  { %1586 = vrcp.f32 %v1016_v7  ;;  %v1187_v13 = vsub.f32 %v1171_v50, %v995_v28  ;;  %v1211_v37 = vmul.f32 1.442695, %v1186_v32  ;;  %v578_v28 = vld [vmem:[#allocation3 + $0x58] sm:$0xff] }
 0x276   :  { %v618_v9 = vpop.xlane.xlu0 %617  ;;  %1086 = vperm.xlu2 %1484, %v1579_v52   ;;  %v764_v52 = vmul.f32 0.0, %v2176_v11 }
 0x277   :  { %v640_v15 = vadd.f32 %v618_v9, %v592_v51  ;;  %v608_v35 = vpop.xlane.xlu1 %607 }
 0x278   :  { %v1583_v49 = vpop.eup %1582  ;;  %v635_v41 = vadd.f32 %v608_v35, %v587_v21 }
 0x279   :  { %657 = vst.msk [vmem:[#allocation3 + $0x48] sm:$0xff] %vm70_vm3, %v640_v15  ;;  %1066 = vperm.xlu0 %1485, %v1583_v49   ;;  %1294 = vperm.xlu1 %1483, %v1232_v22   ;;  %v1009_v33 = vld [vmem:[#allocation3 + $0x40] sm:$0xff]  ;;  %v1585_v29 = vpop.eup %1584  ;;  %v1213_v15 = vmul.f32 1.442695, %v1187_v13 }
 0x27a   :  { %652 = vst.msk [vmem:[#allocation3 + $0x20] sm:$0xff] %vm70_vm3, %v635_v41  ;;  %1588 = vrcp.f32 %v1009_v33  ;;  %v1228_v42 = vmul.f32 %v1585_v29, %v1583_v49  ;;  %v1587_v46 = vpop.eup %1586  ;;  %v1000_v33 = vld [vmem:[#allocation2 + $0x78] sm:$0xff] }
 0x27b   :  { %1590 = vpow2.f32 %v1209_v40  ;;  %v1176_v29 = vld [vmem:[#allocation5 + $0x78] sm:$0xff] }
 0x27c   :  { %1592 = vpow2.f32 %v1201_v19  ;;  %v1192_v34 = vsub.f32 %v1176_v29, %v1000_v33 }
 0x27e   :  { %1274 = vperm.xlu2 %1484, %v1228_v42   ;;  %v1223_v50 = vmul.f32 1.442695, %v1192_v34 }
 0x27f   :  { %v620_v54 = vpop.xlane.xlu1 %619 }
 0x280   :  { %v641_v51 = vadd.f32 %v620_v54, %v593_v44  ;;  %v1589_v2 = vpop.eup %1588  ;;  %v1010_v45 = vld [vmem:[#allocation3 + $0x48] sm:$0xff]  ;;  %v594_v54 = vmul.f32 %v2071_v59, %v578_v28  ;;  %v768_v59 = vmul.f32 0.0, %v2137_v20 }
 0x281   :  { %v821_v9 = vpop.f32.mrf.mxu1  ;;  %1126 = vperm.xlu0 %1485, %v1587_v46   ;;  %v1005_v21 = vld [vmem:[#allocation3 + $0x20] sm:$0xff]  ;;  %1091 = vperm.xlu1 %1483, %v1589_v2   ;;  %v1591_v35 = vpop.eup %1590 }
 0x282   :  { %658 = vst.msk [vmem:[#allocation3 + $0x50] sm:$0xff] %vm70_vm3, %v641_v51  ;;  %v2228_v14 = vadd.f32 %v821_v9, %v764_v52  ;;  %1594 = vrcp.f32 %v1005_v21  ;;  %v1593_v11 = vpop.eup %1592  ;;  %v1233_v7 = vmul.f32 %v1591_v35, %v1589_v2  ;;  %v996_v52 = vld [vmem:[#allocation2 + $0x58] sm:$0xff] }
 0x283   :  { %1596 = vrcp.f32 %v1010_v45  ;;  %v1172_v51 = vld [vmem:[#allocation5 + $0x58] sm:$0xff]  ;;  %v998_v45 = vld [vmem:[#allocation2 + $0x68] sm:$0xff] }
 0x284   :  { %1598 = vpow2.f32 %v1211_v37  ;;  %v1188_v21 = vsub.f32 %v1172_v51, %v996_v52  ;;  %v1174_v37 = vld [vmem:[#allocation5 + $0x68] sm:$0xff]  ;;  %v761_v52 = vmul.f32 0.0, %v2092_v57  ;;  %v760_v57 = vmul.f32 0.0, %v2090_v39 }
 0x285   :  { %1600 = vpow2.f32 %v1213_v15 }
 0x286   :  { %v1215_v13 = vmul.f32 1.442695, %v1188_v21 }
 0x288   :  { %v1595_v49 = vpop.eup %1594 }
 0x289   :  { %v2230_v41 = vpop.f32.mrf.mxu1  ;;  %1299 = vperm.xlu0 %1485, %v1233_v7   ;;  %1071 = vperm.xlu2 %1484, %v1595_v49   ;;  %v1229_v22 = vmul.f32 %v1595_v49, %v1593_v11  ;;  %v1011_v23 = vld [vmem:[#allocation3 + $0x50] sm:$0xff]  ;;  %v1597_v55 = vpop.eup %1596  ;;  %v1190_v49 = vsub.f32 %v1174_v37, %v998_v45 }
 0x28a   :  { %1602 = vrcp.f32 %v1011_v23  ;;  %v1599_v53 = vpop.eup %1598  ;;  %v999_v11 = vld [vmem:[#allocation2 + $0x70] sm:$0xff] }
 0x28b   :  { %1279 = vperm.xlu1 %1483, %v1229_v22   ;;  %v1601_v42 = vpop.eup %1600  ;;  %v1234_v40 = vmul.f32 %v1599_v53, %v1597_v55  ;;  %1604 = vpow2.f32 %v1223_v50  ;;  %v1175_v7 = vld [vmem:[#allocation5 + $0x70] sm:$0xff]  ;;  %v1219_v53 = vmul.f32 1.442695, %v1190_v49 }
 0x28c   :  { %1606 = vpow2.f32 %v1215_v13  ;;  %v1191_v29 = vsub.f32 %v1175_v7, %v999_v11  ;;  %v848_v11 = vpop.f32.mrf.mxu3 }
 0x290   :  { %v1603_v19 = vpop.eup %1602 }
 0x291   :  { %v2232_v43 = vpop.f32.mrf.mxu1  ;;  %1096 = vperm.xlu0 %1485, %v1597_v55   ;;  %1304 = vperm.xlu2 %1484, %v1234_v40   ;;  %v1235_v44 = vmul.f32 %v1603_v19, %v1601_v42  ;;  %v1605_v15 = vpop.eup %1604  ;;  %v1221_v42 = vmul.f32 1.442695, %v1191_v29 }
 0x292   :  { %v1240_v35 = vmul.f32 %v1605_v15, %v1587_v46  ;;  %v809_v55 = vpop.f32.mrf.mxu0  ;;  %v1607_v40 = vpop.eup %1606  ;;  %v769_v46 = vmul.f32 0.0, %v2166_v61 }
 0x293   :  { %1309 = vperm.xlu1 %1483, %v1235_v44   ;;  %v857_v7 = vadd.f32 %v809_v55, %v760_v57 }
 0x297   :  { %v622_v32 = vpop.xlane.xlu2 %621 }
 0x298   :  { %v642_v2 = vadd.f32 %v622_v32, %v594_v54 }
 0x299   :  { %v2235_v9 = vpop.f32.mrf.mxu1  ;;  %1101 = vperm.xlu2 %1484, %v1603_v19  }
 0x29a   :  { %659 = vst.msk [vmem:[#allocation3 + $0x58] sm:$0xff] %vm70_vm3, %v642_v2  ;;  %v812_v54 = vpop.f32.mrf.mxu0 }
 0x29b   :  { %v858_v32 = vadd.f32 %v812_v54, %v761_v52 }
 0x2a1   :  { %v833_v22 = vpop.f32.mrf.mxu1  ;;  %1334 = vperm.xlu2 %1484, %v1240_v35   ;;  %v1012_v23 = vld [vmem:[#allocation3 + $0x58] sm:$0xff] }
 0x2a2   :  { %v2239_v33 = vadd.f32 %v833_v22, %v768_v59  ;;  %1608 = vrcp.f32 %v1012_v23 }
 0x2a3   :  { %1610 = vpow2.f32 %v1219_v53  ;;  %v765_v53 = vmul.f32 0.0, %v2083_v24  ;;  %v1246_v24 = vld [vmem:[#allocation13 + $0x28] sm:$0xff] }
 0x2a4   :  { %1612 = vpow2.f32 %v1221_v42 }
 0x2a5   :  { %v862_v42 = vadd.f32 %v2230_v41, %v765_v53 }
 0x2a8   :  { %v1609_v19 = vpop.eup %1608  ;;  %v1260_v34 = vpop.permute.xlu2 %1259 }
 0x2a9   :  { %v1337_v20 = vmul.f32 %v2086_v38, %v1260_v34  ;;  %v836_v44 = vpop.f32.mrf.mxu1  ;;  %1106 = vperm.xlu1 %1483, %v1609_v19   ;;  %v1236_v28 = vmul.f32 %v1609_v19, %v1607_v40  ;;  %v1611_v51 = vpop.eup %1610 }
 0x2aa   :  { %v2243_v50 = vadd.f32 %v836_v44, %v769_v46  ;;  %v1238_v2 = vmul.f32 %v1611_v51, %v2209_v18  ;;  %v1613_v61 = vpop.eup %1612  ;;  %v773_v18 = vmul.f32 0.0, %v2105_v60 }
 0x2ab   :  { %1353 = vst [vmem:[#allocation13] sm:$0xff] %v1337_v20  ;;  %1314 = vperm.xlu0 %1485, %v1236_v28   ;;  %v1239_v38 = vmul.f32 %v1613_v61, %v2217_v62  ;;  %v767_v20 = vmul.f32 0.0, %v2135_v6 }
 0x2ac   :  { %v870_v49 = vadd.f32 %v848_v11, %v773_v18 }
 0x2b0   :  { %v1057_v21 = vpop.permute.xlu2 %1056 }
 0x2b1   :  { %v1130_v13 = vmul.f32 %v1057_v21, %v858_v32  ;;  %v2247_v45 = vpop.f32.mrf.mxu1  ;;  %1324 = vperm.xlu1 %1483, %v1238_v2   ;;  %v766_v32 = vmul.f32 0.0, %v2129_v4  ;;  %v774_v4 = vmul.f32 0.0, %v2126_v12 }
 0x2b3   :  { %1146 = vst [vmem:[#allocation12 + $0x8] sm:$0xff] %v1130_v13  ;;  %1329 = vperm.xlu0 %1485, %v1239_v38  }
 0x2b8   :  { %v1320_v37 = vpop.permute.xlu2 %1319 }
 0x2b9   :  { %v1349_v15 = vmul.f32 %v2094_v58, %v1320_v37  ;;  %v2251_v35 = vpop.f32.mrf.mxu1  ;;  %v772_v58 = vmul.f32 0.0, %v2107_v63  ;;  %v864_v63 = vadd.f32 %v2235_v9, %v767_v20  ;;  %v851_v37 = vpop.f32.mrf.mxu3 }
 0x2bb   :  { %1365 = vst [vmem:[#allocation13 + $0x60] sm:$0xff] %v1349_v15  ;;  %v871_v15 = vadd.f32 %v851_v37, %v774_v4 }
 0x2be   :  { %v1052_v59 = vpop.permute.xlu0 %1051 }
 0x2bf   :  { %v1129_v22 = vmul.f32 %v1052_v59, %v857_v7 }
 0x2c0   :  { %v1117_v23 = vpop.permute.xlu2 %1116 }
 0x2c1   :  { %1145 = vst [vmem:[#allocation12] sm:$0xff] %v1129_v22  ;;  %v1142_v62 = vmul.f32 %v1117_v23, %v870_v49  ;;  %v845_v29 = vpop.f32.mrf.mxu1  ;;  %v854_v12 = vpop.f32.mrf.mxu3  ;;  %v770_v22 = vmul.f32 0.0, %v2181_v36  ;;  %v775_v23 = vmul.f32 0.0, %v2160_v26 }
 0x2c2   :  { %v869_v39 = vadd.f32 %v845_v29, %v772_v58 }
 0x2c3   :  { %1158 = vst [vmem:[#allocation12 + $0x68] sm:$0xff] %v1142_v62  ;;  %v867_v62 = vadd.f32 %v2247_v45, %v770_v22 }
 0x2c6   :  { %v1077_v40 = vpop.permute.xlu1 %1076  ;;  %v1112_v19 = vpop.permute.xlu0 %1111 }
 0x2c7   :  { %v1134_v46 = vmul.f32 %v1077_v40, %v862_v42  ;;  %v1141_v60 = vmul.f32 %v1112_v19, %v869_v39 }
 0x2c8   :  { %v1290_v55 = vpop.permute.xlu2 %1289 }
 0x2c9   :  { %1150 = vst [vmem:[#allocation12 + $0x28] sm:$0xff] %v1134_v46  ;;  %v1343_v34 = vmul.f32 %v2113_v5, %v1290_v55  ;;  %v863_v5 = vadd.f32 %v2232_v43, %v766_v32  ;;  %v771_v55 = vmul.f32 0.0, %v2178_v8 }
 0x2ca   :  { %1157 = vst [vmem:[#allocation12 + $0x60] sm:$0xff] %v1141_v60 }
 0x2cb   :  { %1359 = vst [vmem:[#allocation13 + $0x30] sm:$0xff] %v1343_v34 }
 0x2ce   :  { %v1265_v44 = vpop.permute.xlu1 %1264  ;;  %v1285_v28 = vpop.permute.xlu0 %1284 }
 0x2cf   :  { %v1338_v41 = vmul.f32 %v2096_v48, %v1265_v44  ;;  %v1342_v54 = vmul.f32 %v1285_v28, %v1246_v24 }
 0x2d0   :  { %v1087_v52 = vpop.permute.xlu2 %1086 }
 0x2d1   :  { %1354 = vst [vmem:[#allocation13 + $0x8] sm:$0xff] %v1338_v41  ;;  %v1136_v51 = vmul.f32 %v1087_v52, %v864_v63 }
 0x2d2   :  { %1358 = vst [vmem:[#allocation13 + $0x28] sm:$0xff] %v1342_v54 }
 0x2d3   :  { %1152 = vst [vmem:[#allocation12 + $0x38] sm:$0xff] %v1136_v51 }
 0x2d6   :  { %v1082_v2 = vpop.permute.xlu0 %1081 }
 0x2d7   :  { %v1135_v61 = vmul.f32 %v1082_v2, %v863_v5 }
 0x2d8   :  { %v1275_v6 = vpop.permute.xlu2 %1274 }
 0x2d9   :  { %1151 = vst [vmem:[#allocation12 + $0x30] sm:$0xff] %v1135_v61  ;;  %v1340_v21 = vmul.f32 %v2122_v25, %v1275_v6 }
 0x2db   :  { %1356 = vst [vmem:[#allocation13 + $0x18] sm:$0xff] %v1340_v21  ;;  %v1062_v9 = vpop.permute.xlu1 %1061 }
 0x2dc   :  { %v1131_v48 = vmul.f32 %v1062_v9, %v2201_v1 }
 0x2de   :  { %v1270_v13 = vpop.permute.xlu0 %1269  ;;  %1147 = vst [vmem:[#allocation12 + $0x10] sm:$0xff] %v1131_v48 }
 0x2df   :  { %v1339_v38 = vmul.f32 %v2110_v0, %v1270_v13 }
 0x2e1   :  { %1355 = vst [vmem:[#allocation13 + $0x10] sm:$0xff] %v1339_v38 }
 0x2e3   :  { %v1072_v43 = vpop.permute.xlu2 %1071  ;;  %v1122_v57 = vpop.permute.xlu1 %1121 }
 0x2e4   :  { %v1133_v11 = vmul.f32 %v1072_v43, %v2228_v14  ;;  %v1143_v18 = vmul.f32 %v1122_v57, %v871_v15  ;;  %v872_v14 = vadd.f32 %v854_v12, %v775_v23 }
 0x2e6   :  { %1149 = vst [vmem:[#allocation12 + $0x20] sm:$0xff] %v1133_v11 }
 0x2e7   :  { %1159 = vst [vmem:[#allocation12 + $0x70] sm:$0xff] %v1143_v18 }
 0x2eb   :  { %v1067_v25 = vpop.permute.xlu0 %1066  ;;  %v1305_v7 = vpop.permute.xlu2 %1304 }
 0x2ec   :  { %v1295_v59 = vpop.permute.xlu1 %1294  ;;  %v1132_v1 = vmul.f32 %v1067_v25, %v2207_v3  ;;  %v1346_v49 = vmul.f32 %v2153_v56, %v1305_v7 }
 0x2ed   :  { %v1344_v0 = vmul.f32 %v2116_v16, %v1295_v59 }
 0x2ee   :  { %1148 = vst [vmem:[#allocation12 + $0x18] sm:$0xff] %v1132_v1 }
 0x2ef   :  { %1360 = vst [vmem:[#allocation13 + $0x38] sm:$0xff] %v1344_v0 }
 0x2f0   :  { %1362 = vst [vmem:[#allocation13 + $0x48] sm:$0xff] %v1346_v49 }
 0x2f3   :  { %v1127_v29 = vpop.permute.xlu0 %1126  ;;  %v1102_v53 = vpop.permute.xlu2 %1101 }
 0x2f4   :  { %v1092_v58 = vpop.permute.xlu1 %1091  ;;  %v1144_v42 = vmul.f32 %v1127_v29, %v872_v14  ;;  %v1139_v3 = vmul.f32 %v1102_v53, %v867_v62 }
 0x2f5   :  { %v1137_v56 = vmul.f32 %v1092_v58, %v2239_v33 }
 0x2f6   :  { %1160 = vst [vmem:[#allocation12 + $0x78] sm:$0xff] %v1144_v42 }
 0x2f7   :  { %1153 = vst [vmem:[#allocation12 + $0x40] sm:$0xff] %v1137_v56 }
 0x2f8   :  { %1155 = vst [vmem:[#allocation12 + $0x50] sm:$0xff] %v1139_v3 }
 0x2fb   :  { %v1300_v16 = vpop.permute.xlu0 %1299  ;;  %v1335_v39 = vpop.permute.xlu2 %1334 }
 0x2fc   :  { %v1345_v36 = vmul.f32 %v2147_v17, %v1300_v16  ;;  %v1352_v26 = vmul.f32 %v2140_v30, %v1335_v39  ;;  %v868_v30 = vadd.f32 %v2251_v35, %v771_v55 }
 0x2fd   :  { %v1280_v40 = vpop.permute.xlu1 %1279 }
 0x2fe   :  { %1361 = vst [vmem:[#allocation13 + $0x40] sm:$0xff] %v1345_v36  ;;  %v1341_v45 = vmul.f32 %v2155_v27, %v1280_v40 }
 0x2ff   :  { %1368 = vst [vmem:[#allocation13 + $0x78] sm:$0xff] %v1352_v26 }
 0x300   :  { %1357 = vst [vmem:[#allocation13 + $0x20] sm:$0xff] %v1341_v45 }
 0x303   :  { %v1097_v19 = vpop.permute.xlu0 %1096 }
 0x304   :  { %v1138_v46 = vmul.f32 %v1097_v19, %v2243_v50 }
 0x305   :  { %v1310_v60 = vpop.permute.xlu1 %1309 }
 0x306   :  { %1154 = vst [vmem:[#allocation12 + $0x48] sm:$0xff] %v1138_v46  ;;  %v1347_v33 = vmul.f32 %v2162_v31, %v1310_v60  ;;  %v1254_v31 = vld [vmem:[#allocation13 + $0x68] sm:$0xff] }
 0x308   :  { %1363 = vst [vmem:[#allocation13 + $0x50] sm:$0xff] %v1347_v33 }
 0x31b   :  { %v1107_v17 = vpop.permute.xlu1 %1106 }
 0x31c   :  { %v1140_v27 = vmul.f32 %v1107_v17, %v868_v30 }
 0x31d   :  { %v1315_v50 = vpop.permute.xlu0 %1314 }
 0x31e   :  { %1156 = vst [vmem:[#allocation12 + $0x58] sm:$0xff] %v1140_v27  ;;  %v1348_v34 = vmul.f32 %v2171_v10, %v1315_v50 }
 0x31f   :  { %1381 = dma.vmem_to_hbm [thread:$0]  %s1374_s30, 2048, %s1376_s7, [#allocation8], %s1743_s23, %s1743_s23, %s1744_s24  }
 0x320   :  { %1364 = vst [vmem:[#allocation13 + $0x58] sm:$0xff] %v1348_v34 }
 0x323   :  { %v1325_v8 = vpop.permute.xlu1 %1324 }
 0x324   :  { %v1350_v35 = vmul.f32 %v1325_v8, %v1254_v31 }
 0x325   :  { %v1330_v20 = vpop.permute.xlu0 %1329 }
 0x326   :  { %1366 = vst [vmem:[#allocation13 + $0x68] sm:$0xff] %v1350_v35  ;;  %v1351_v44 = vmul.f32 %v2131_v47, %v1330_v20 }
 0x328   :  { %1367 = vst [vmem:[#allocation13 + $0x70] sm:$0xff] %v1351_v44 }
 0x329   :  { %1394 = dma.vmem_to_hbm [thread:$0]  %s1387_s9, 2048, %s1389_s11, [#allocation14], %s1743_s23, %s1743_s23, %s1744_s24  }
 0x32a   :  { %1738 = dma.done.wait [#allocation8], 2048  }
 0x32b   :  { %1739 = vsyncadd [#allocation8], 4294965248 }
 0x32c   :  { %1740 = dma.done.wait [#allocation14], 2048  }
 0x32d   :  { %1741 = vsyncadd [#allocation14], 4294965248 }
 0x32e   :  { %1403 = vsyncpa [#allocation7], 1 }
 0x32f   :  { %1404 = vsyncpa [#allocation10], 1 }
 0x330   :  { %1405 = vsyncpa [#allocation8], 1 }
 0x331   :  { %1406 = vsyncpa [#allocation14], 1 }

</bundles_post_ra>
